<compile_context>
chip_gen: v7x
topology: tpu7x:2x2x1
jax: 0.10.0
libtpu: 0.0.40
codegen_flags: <defaults>
</compile_context>

<pallas_src>
import functools

import jax
import jax.numpy as jnp
from jax.experimental import pallas as pl
from jax.experimental.pallas import tpu as pltpu


PACK = 8  # rows packed per lane group: 8 rows * d_out=16 -> 128 lanes (dense)


def _round_up(x, m):
    return (x + m - 1) // m * m


def _smlp_kernel(n_layers, chunk_p, n_chunks, *refs):
    """refs = (x_ref, w0, b0, w1, b1, ..., w{L-1}, b{L-1}, o_ref), row-packed."""
    x_ref = refs[0]
    o_ref = refs[-1]
    wb = refs[1:-1]
    cdt = wb[0].dtype  # bf16 compute dtype (weights already cast in wrapper)

    # Hoist the (tiny) bias loads out of the unrolled chunk loop (JAX does not
    # CSE repeated ref reads).  Weights are *not* hoisted: they are 256-512 KB
    # each, so reading them at the dot lets Mosaic stream them from VMEM.
    biases = [wb[2 * i + 1][...] for i in range(n_layers)]

    # Short, fully-unrolled sub-chunk loop (<= 8 iters): bounds per-layer
    # activations to ~(32, 512) so vreg pressure stays comfortable while the
    # LLO scheduler can interleave MXU pushes with the next chunk's loads.
    for c in range(n_chunks):
        lo, hi = c * chunk_p, (c + 1) * chunk_p
        # Fused f32 -> bf16 cast of the activation slice (idle-VALU work;
        # replaces a separate wrapper-level HBM pass over x).
        h = x_ref[lo:hi, :].astype(cdt)
        for i in range(n_layers):
            acc = jnp.dot(h, wb[2 * i][...],
                          preferred_element_type=jnp.float32) + biases[i]
            if i < n_layers - 1:                    # ReLU between layers only
                h = jnp.maximum(acc, 0.0).astype(cdt)
            else:
                h = acc                             # final layer stays f32
        o_ref[lo:hi, :] = h.astype(o_ref.dtype)     # lane-dense (128-wide) store


def smlp_forward(x, weights, biases, *, tile_rows=2048, chunk_rows=256,
                 compute_dtype=jnp.bfloat16, out_dtype=None):
    """x: [N, dims[0]]; weights[i]: [dims[i], dims[i+1]]; biases[i]: [1, dims[i+1]].
    Returns [N, dims[-1]] in out_dtype (default x.dtype)."""
    n_layers = len(weights)
    N, d_in = x.shape
    d_out = weights[-1].shape[1]
    out_dtype = x.dtype if out_dtype is None else out_dtype

    # ---- row packing: 8 consecutive rows share one packed row --------------
    n8 = _round_up(N, PACK)
    if n8 != N:                       # ragged tail: pad at most PACK-1 rows
        x = jnp.pad(x, ((0, n8 - N), (0, 0)))
    np_rows = n8 // PACK
    x_p = x.reshape(np_rows, PACK * d_in)          # row-major, effectively free

    # y_packed = x_packed @ kron(I8, W) + tile(b, 8)  ==  row-wise x @ W + b
    w_p = [jnp.kron(jnp.eye(PACK, dtype=w.dtype), w).astype(compute_dtype)
           for w in weights]
    b_p = [jnp.tile(b.reshape(1, -1).astype(jnp.float32), (1, PACK))
           for b in biases]

    # ---- tile sizing --------------------------------------------------------
    # Big tiles amortize the ~0.35us/grid-step overhead; keep >=8 steps when N
    # allows so v7x's two TensorCores each get >=2 double-buffered steps.
    chunk_p = max(8, chunk_rows // PACK)                # 256 rows -> 32 packed
    max_tile_p = max(chunk_p, tile_rows // PACK)        # 2048 rows -> 256 packed
    tile_p = min(max_tile_p, max(8, _round_up(pl.cdiv(np_rows, 8), 8)))
    if tile_p >= chunk_p:
        tile_p = _round_up(tile_p, chunk_p)
    else:
        chunk_p = tile_p
    n_chunks = tile_p // chunk_p
    grid = (pl.cdiv(np_rows, tile_p),)   # ragged tail masked by Pallas bounds

    kernel = functools.partial(_smlp_kernel, n_layers, chunk_p, n_chunks)

    in_specs = [pl.BlockSpec((tile_p, PACK * d_in), lambda i: (i, 0))]
    for wp, bp in zip(w_p, b_p):
        in_specs.append(pl.BlockSpec(wp.shape, lambda i: (0, 0)))   # VMEM resident
        in_specs.append(pl.BlockSpec(bp.shape, lambda i: (0, 0)))   # VMEM resident
    out_spec = pl.BlockSpec((tile_p, PACK * d_out), lambda i: (i, 0))

    out_p = pl.pallas_call(
        kernel,
        out_shape=jax.ShapeDtypeStruct((np_rows, PACK * d_out), out_dtype),
        grid_spec=pltpu.PrefetchScalarGridSpec(
            num_scalar_prefetch=0,
            grid=grid,
            in_specs=in_specs,
            out_specs=out_spec,
        ),
        compiler_params=pltpu.CompilerParams(
            dimension_semantics=("parallel",)),
    )(x_p, *[a for pair in zip(w_p, b_p) for a in pair])

    out = out_p.reshape(n8, d_out)                 # row-major, effectively free
    return out if n8 == N else out[:N]


def init_params(dims, key):
    """Shapes matching MinkowskiLinear(last_dim, dim, bias=True); weight kept [in, out]."""
    weights, biases = [], []
    for i in range(len(dims) - 1):
        key, kw, kb = jax.random.split(key, 3)
        bound = 1.0 / float(dims[i]) ** 0.5
        w = jax.random.uniform(kw, (dims[i], dims[i + 1]), jnp.float32, -bound, bound)
        b = jax.random.uniform(kb, (1, dims[i + 1]), jnp.float32, -bound, bound)
        weights.append(w)
        biases.append(b)
    return weights, biases


def smlp_reference(x, weights, biases, compute_dtype=jnp.bfloat16):
    # Mirrors the kernel numerics: bf16 matmul operands, f32 accumulation,
    # f32 bias add / ReLU, bf16 re-cast between layers.
    h = x.astype(compute_dtype).astype(jnp.float32)
    for i, (w, b) in enumerate(zip(weights, biases)):
        h = h @ w.astype(compute_dtype).astype(jnp.float32) \
            + b.reshape(1, -1).astype(jnp.float32)
        if i < len(weights) - 1:
            h = jnp.maximum(h, 0.0).astype(compute_dtype).astype(jnp.float32)
    return h.astype(x.dtype)


if __name__ == "__main__":
    dims = (32, 64, 64, 16)     # SMLP(dims=[32, 64, 64, 16])
    N = 2000                    # 250 packed rows -> 8 grid steps, ragged last block

    key = jax.random.PRNGKey(0)
    key, kx = jax.random.split(key)
    x = jax.random.normal(kx, (N, dims[0]), jnp.float32)
    weights, biases = init_params(dims, key)

    out = smlp_forward(x, weights, biases)
    out = jax.block_until_ready(out)

    ref = smlp_reference(x, weights, biases)
    assert out.shape == (N, dims[-1])
    assert jnp.allclose(out, ref, atol=1e-2, rtol=1e-2), "mismatch vs reference"

    print("KERNEL_OK")
</pallas_src>

<mosaic_0001>
module attributes {stable_mosaic.version = 11 : i64} {
  func.func @_smlp_kernel(%arg0: i32, %arg1: memref<32x256xf32, #tpu.memory_space<vmem>>, %arg2: memref<256x512xbf16, #tpu.memory_space<vmem>>, %arg3: memref<1x512xf32, #tpu.memory_space<vmem>>, %arg4: memref<512x512xbf16, #tpu.memory_space<vmem>>, %arg5: memref<1x512xf32, #tpu.memory_space<vmem>>, %arg6: memref<512x128xbf16, #tpu.memory_space<vmem>>, %arg7: memref<1x128xf32, #tpu.memory_space<vmem>>, %arg8: memref<32x128xf32, #tpu.memory_space<vmem>>) attributes {dimension_semantics = [#tpu.dimension_semantics<parallel>], iteration_bounds = array<i64: 8>, scalar_prefetch = 0 : i64, scratch_operands = 0 : i64, tpu.core_type = #tpu.core_type<tc>, window_params = [{transform_indices = @transform_0, window_bounds = array<i64: 32, 256>}, {pipeline_mode = #tpu.pipeline_mode<synchronous>, transform_indices = @transform_1, window_bounds = array<i64: 256, 512>}, {pipeline_mode = #tpu.pipeline_mode<synchronous>, transform_indices = @transform_2, window_bounds = array<i64: 1, 512>}, {pipeline_mode = #tpu.pipeline_mode<synchronous>, transform_indices = @transform_3, window_bounds = array<i64: 512, 512>}, {pipeline_mode = #tpu.pipeline_mode<synchronous>, transform_indices = @transform_4, window_bounds = array<i64: 1, 512>}, {pipeline_mode = #tpu.pipeline_mode<synchronous>, transform_indices = @transform_5, window_bounds = array<i64: 512, 128>}, {pipeline_mode = #tpu.pipeline_mode<synchronous>, transform_indices = @transform_6, window_bounds = array<i64: 1, 128>}, {transform_indices = @transform_7, window_bounds = array<i64: 32, 128>}]} {
    %c0 = arith.constant 0 : index
    %c0_0 = arith.constant 0 : index
    %0 = vector.load %arg3[%c0, %c0_0] : memref<1x512xf32, #tpu.memory_space<vmem>>, vector<1x512xf32>
    %c0_1 = arith.constant 0 : index
    %c0_2 = arith.constant 0 : index
    %1 = vector.load %arg5[%c0_1, %c0_2] : memref<1x512xf32, #tpu.memory_space<vmem>>, vector<1x512xf32>
    %c0_3 = arith.constant 0 : index
    %c0_4 = arith.constant 0 : index
    %2 = vector.load %arg7[%c0_3, %c0_4] : memref<1x128xf32, #tpu.memory_space<vmem>>, vector<1x128xf32>
    %c0_5 = arith.constant 0 : index
    %c0_6 = arith.constant 0 : index
    %3 = vector.load %arg1[%c0_5, %c0_6] : memref<32x256xf32, #tpu.memory_space<vmem>>, vector<32x256xf32>
    %4 = arith.truncf %3 : vector<32x256xf32> to vector<32x256xbf16>
    %c0_7 = arith.constant 0 : index
    %c0_8 = arith.constant 0 : index
    %5 = vector.load %arg2[%c0_7, %c0_8] : memref<256x512xbf16, #tpu.memory_space<vmem>>, vector<256x512xbf16>
    %cst = arith.constant dense<0.000000e+00> : vector<32x512xf32>
    %6 = tpu.matmul %4, %5, %cst {dimension_numbers = #tpu.dot_dimension_numbers<[1], [0], [0], [1], [0, 0, 1, 1], [], []>} : vector<32x256xbf16>, vector<256x512xbf16>, vector<32x512xf32> -> vector<32x512xf32>
    %7 = vector.broadcast %0 : vector<1x512xf32> to vector<32x512xf32>
    %8 = arith.addf %6, %7 : vector<32x512xf32>
    %cst_9 = arith.constant 0.000000e+00 : f32
    %9 = vector.broadcast %cst_9 : f32 to vector<32x512xf32>
    %10 = arith.maximumf %8, %9 : vector<32x512xf32>
    %11 = arith.truncf %10 : vector<32x512xf32> to vector<32x512xbf16>
    %c0_10 = arith.constant 0 : index
    %c0_11 = arith.constant 0 : index
    %12 = vector.load %arg4[%c0_10, %c0_11] : memref<512x512xbf16, #tpu.memory_space<vmem>>, vector<512x512xbf16>
    %cst_12 = arith.constant dense<0.000000e+00> : vector<32x512xf32>
    %13 = tpu.matmul %11, %12, %cst_12 {dimension_numbers = #tpu.dot_dimension_numbers<[1], [0], [0], [1], [0, 0, 1, 1], [], []>} : vector<32x512xbf16>, vector<512x512xbf16>, vector<32x512xf32> -> vector<32x512xf32>
    %14 = vector.broadcast %1 : vector<1x512xf32> to vector<32x512xf32>
    %15 = arith.addf %13, %14 : vector<32x512xf32>
    %cst_13 = arith.constant 0.000000e+00 : f32
    %16 = vector.broadcast %cst_13 : f32 to vector<32x512xf32>
    %17 = arith.maximumf %15, %16 : vector<32x512xf32>
    %18 = arith.truncf %17 : vector<32x512xf32> to vector<32x512xbf16>
    %c0_14 = arith.constant 0 : index
    %c0_15 = arith.constant 0 : index
    %19 = vector.load %arg6[%c0_14, %c0_15] : memref<512x128xbf16, #tpu.memory_space<vmem>>, vector<512x128xbf16>
    %cst_16 = arith.constant dense<0.000000e+00> : vector<32x128xf32>
    %20 = tpu.matmul %18, %19, %cst_16 {dimension_numbers = #tpu.dot_dimension_numbers<[1], [0], [0], [1], [0, 0, 1, 1], [], []>} : vector<32x512xbf16>, vector<512x128xbf16>, vector<32x128xf32> -> vector<32x128xf32>
    %21 = vector.broadcast %2 : vector<1x128xf32> to vector<32x128xf32>
    %22 = arith.addf %20, %21 : vector<32x128xf32>
    %c0_17 = arith.constant 0 : index
    %c0_18 = arith.constant 0 : index
    %23 = vector.load %arg8[%c0_17, %c0_18] : memref<32x128xf32, #tpu.memory_space<vmem>>, vector<32x128xf32>
    tpu.vector_store %arg8[%c0_17, %c0_18], %22 {strides = array<i32>} : memref<32x128xf32, #tpu.memory_space<vmem>>, vector<32x128xf32>,
    return
  }
  func.func @transform_0(%arg0: i32) -> (i32, i32) {
    %c0_i32 = arith.constant 0 : i32
    %c0_i32_0 = arith.constant 0 : i32
    return %arg0, %c0_i32 : i32, i32
  }
  func.func @transform_1(%arg0: i32) -> (i32, i32) {
    %c0_i32 = arith.constant 0 : i32
    %c0_i32_0 = arith.constant 0 : i32
    %c0_i32_1 = arith.constant 0 : i32
    return %c0_i32, %c0_i32_0 : i32, i32
  }
  func.func @transform_2(%arg0: i32) -> (i32, i32) {
    %c0_i32 = arith.constant 0 : i32
    %c0_i32_0 = arith.constant 0 : i32
    %c0_i32_1 = arith.constant 0 : i32
    return %c0_i32, %c0_i32_0 : i32, i32
  }
  func.func @transform_3(%arg0: i32) -> (i32, i32) {
    %c0_i32 = arith.constant 0 : i32
    %c0_i32_0 = arith.constant 0 : i32
    %c0_i32_1 = arith.constant 0 : i32
    return %c0_i32, %c0_i32_0 : i32, i32
  }
  func.func @transform_4(%arg0: i32) -> (i32, i32) {
    %c0_i32 = arith.constant 0 : i32
    %c0_i32_0 = arith.constant 0 : i32
    %c0_i32_1 = arith.constant 0 : i32
    return %c0_i32, %c0_i32_0 : i32, i32
  }
  func.func @transform_5(%arg0: i32) -> (i32, i32) {
    %c0_i32 = arith.constant 0 : i32
    %c0_i32_0 = arith.constant 0 : i32
    %c0_i32_1 = arith.constant 0 : i32
    return %c0_i32, %c0_i32_0 : i32, i32
  }
  func.func @transform_6(%arg0: i32) -> (i32, i32) {
    %c0_i32 = arith.constant 0 : i32
    %c0_i32_0 = arith.constant 0 : i32
    %c0_i32_1 = arith.constant 0 : i32
    return %c0_i32, %c0_i32_0 : i32, i32
  }
  func.func @transform_7(%arg0: i32) -> (i32, i32) {
    %c0_i32 = arith.constant 0 : i32
    %c0_i32_0 = arith.constant 0 : i32
    return %arg0, %c0_i32 : i32, i32
  }
}

</mosaic_0001>

<bundles_post_ra>
// kernel: tpu_custom_call.1
= control target key start
LH: loop header
LB: loop body
LE: loop exit
PB: predicated region body
PF: predicated region fallthrough
CT: control target
= control target key end

     0   :  { %12 = vsyncpa [#allocation3], 0  ;;  %s3701_s0 = inlined_call_operand.hbm [shape: f32[250,256], index: 0, kind: input, shape index: {}]   ;;  %s3702_s1 = inlined_call_operand.hbm [shape: bf16[256,512], index: 1, kind: input, shape index: {}]   ;;  %s3703_s2 = inlined_call_operand.vmem [shape: f32[1,512], index: 2, kind: input, shape index: {}]   ;;  %s3704_s3 = inlined_call_operand.hbm [shape: bf16[512,512], index: 3, kind: input, shape index: {}]   ;;  %s3705_s4 = inlined_call_operand.vmem [shape: f32[1,512], index: 4, kind: input, shape index: {}]   ;;  %s3706_s5 = inlined_call_operand.hbm [shape: bf16[512,128], index: 5, kind: input, shape index: {}]   ;;  %s3707_s6 = inlined_call_operand.vmem [shape: f32[1,128], index: 6, kind: input, shape index: {}]   ;;  %s3708_s7 = inlined_call_operand.hbm [shape: f32[250,128], index: 7, kind: output, shape index: {}]  }
   0x1   :  { %14 = vsyncpa [#allocation3 + $0x1], 0 }
   0x2   :  { %15 = vsyncpa [#allocation6], 0 }
   0x3   :  { %16 = vsyncpa [#allocation9], 0 }
   0x4   :  { %17 = vsyncpa [#allocation4], 0 }
   0x5   :  { %19 = vsyncpa [#allocation4 + $0x1], 0  ;;  %s3381_s24 = smov 0   ;;  %s3383_s25 = smov 0  }
   0x6   :  { %s3385_s26 = smov 0   ;;  %s3387_s27 = smov 0  }
   0x7 LB: > { %s3402_s28 = sadd.s32 4294967295, %s3328_s27   ;;  %s2400_s29 = sadd.s32 4294967294, %s3328_s27   ;;  %s3328_s27 = sphi %s3387_s27, %s3733_s27   ;;  %s3324_s26 = sphi %s3385_s26, %s3732_s26   ;;  %s3320_s25 = sphi %s3383_s25, %s3731_s25   ;;  %s3316_s24 = sphi %s3381_s24, %s3730_s24  }
   0x8   : > { %p45_p0 = scmp.ne.s32.totalorder %s3320_s25, %s3316_s24  ;;  %p3709_p1 = scmp.eq.s32.totalorder %s3402_s28, 0 }
   0x9   : > { %p201_p3 = scmp.eq.s32.totalorder %s2400_s29, 7  ;;  %p2401_p5 = scmp.ge.s32.totalorder %s3328_s27, 1 }
   0xa   : > { %p3411_p4 = por %p3709_p1, %p45_p0  ;;  %p208_p7 = scmp.lt.s32.totalorder %s3328_s27, 9 }
   0xb   : > { %p3416_p6 = por %p201_p3, %p45_p0  ;;  %s3330_s10 = smov [#allocation5]  }
   0xc   : > { %s3713_s30 = scalar_select %p3411_p4, 1, 0 }
   0xd   : > { %s3714_s8 = scalar_select %p3416_p6, 1, 0 }
   0xe   : > { %p3421_p8 = pnand %p2401_p5, %p208_p7  ;;  %s220_s11 = sshll.u32 %s3330_s10, 4  ;;  %s3425_s11 = int_to_ptr.vmem [resolvable:$true] %s220_s11 }
   0xf   : > { %3715 = sst [smem:[#allocation15_spill]] %s3714_s8  ;;  %s3331_s13 = smov [#allocation7]  }
  0x10   : > { %s3716_s9 = scalar_select %p3421_p8, 1, 0 }
  0x11   : > { %p2753_p9 = pneg %p3421_p8  ;;  %s236_s14 = sshll.u32 %s3331_s13, 4  ;;  %s3435_s14 = int_to_ptr.vmem [resolvable:$true] %s236_s14 }
  0x12   : > { %s3332_s15 = smov [#allocation8]   ;;  %s3140_s19 = scalar_lea.hbm %s3702_s1, 8192 }
  0x13   : > { %p3431_p10 = pnand %p2753_p9, %p3709_p1  ;;  %s3437_s16 = sshll.u32 %s3332_s15, 4  ;;  %s253_s16 = int_to_ptr.vmem [resolvable:$true] %s3437_s16 }
  0x14   : > { %p3141_p11 = scmp.ne.s32.totalorder %s3702_s1, %s3140_s19  ;;  %p3147_p3 = scmp.lt.u32.totalorder %s3140_s19, %s3702_s1 }
  0x15   : > { %p3447_p12 = pneg %p3431_p10 }
  0x17   : > { %p3143_p13 = pnand %p3447_p12, %p3141_p11 }
  0x19   : > { %p3144_p0 = pneg %p3143_p13 }
  0x1b   : > { %p3149_p5 = pnand %p3147_p3, %p3144_p0 }
  0x1d   : > { %3152 = shalt.err (!%p3149_p5)
}
  0x1e   : > { %s3153_s10 = scalar_lea.vmem %s3425_s11, 8192  ;;  %p3161_p2 = scmp.lt.s32.totalorder %s3425_s11, %s3425_s11 }
  0x1f   : > { %p3154_p7 = scmp.ne.s32.totalorder %s3425_s11, %s3153_s10  ;;  %p3162_p6 = scmp.lt.s32.totalorder %s3153_s10, %s3153_s10 }
  0x21   : > { %p3156_p9 = pnand %p3154_p7, %p3447_p12  ;;  %p3163_p11 = por %p3162_p6, %p3161_p2 }
  0x23   : > { %p3157_p1 = pneg %p3156_p9 }
  0x25   : > { %p3164_p13 = pnand %p3163_p11, %p3157_p1 }
  0x27   : > { %3167 = shalt.err (!%p3164_p13)
}
  0x28   : > { %s3333_s13 = smov 256   ;;  %s3334_s15 = smov 16  }
  0x29   : > { %2756 = dma.hbm_to_vmem [thread:$0]  (!%p3431_p10), %s3702_s1, 8192, %s3425_s11, [#allocation6], %s3333_s13, %s3333_s13, %s3334_s15  }
  0x2a   : > { %s3168_s21 = scalar_lea.hbm %s3704_s3, 16384 }
  0x2b   : > { %p3169_p1 = scmp.ne.s32.totalorder %s3704_s3, %s3168_s21  ;;  %p3175_p0 = scmp.lt.u32.totalorder %s3168_s21, %s3704_s3 }
  0x2d   : > { %p3171_p2 = pnand %p3169_p1, %p3447_p12 }
  0x2f   : > { %p3172_p6 = pneg %p3171_p2 }
  0x31   : > { %p3177_p3 = pnand %p3175_p0, %p3172_p6 }
  0x33   : > { %3180 = shalt.err (!%p3177_p3)
}
  0x34   : > { %s3181_s11 = scalar_lea.vmem %s3435_s14, 16384  ;;  %p3189_p11 = scmp.lt.s32.totalorder %s3435_s14, %s3435_s14 }
  0x35   : > { %p3182_p5 = scmp.ne.s32.totalorder %s3435_s14, %s3181_s11  ;;  %p3190_p13 = scmp.lt.s32.totalorder %s3181_s11, %s3181_s11 }
  0x37   : > { %p3184_p7 = pnand %p3182_p5, %p3447_p12  ;;  %p3191_p1 = por %p3190_p13, %p3189_p11 }
  0x39   : > { %p3185_p9 = pneg %p3184_p7 }
  0x3b   : > { %p3192_p2 = pnand %p3191_p1, %p3185_p9 }
  0x3d   : > { %3195 = shalt.err (!%p3192_p2)
}
  0x3e   : > { %2759 = dma.hbm_to_vmem [thread:$0]  (!%p3431_p10), %s3704_s3, 16384, %s3435_s14, [#allocation6], %s3333_s13, %s3333_s13, %s3334_s15  }
  0x3f   : > { %s3196_s20 = scalar_lea.hbm %s3706_s5, 4096 }
  0x40   : > { %p3197_p6 = scmp.ne.s32.totalorder %s3706_s5, %s3196_s20  ;;  %p3203_p5 = scmp.lt.u32.totalorder %s3196_s20, %s3706_s5 }
  0x42   : > { %p3199_p0 = pnand %p3197_p6, %p3447_p12 }
  0x44   : > { %p3200_p3 = pneg %p3199_p0 }
  0x46   : > { %p3205_p7 = pnand %p3203_p5, %p3200_p3 }
  0x48   : > { %3208 = shalt.err (!%p3205_p7)
}
  0x49   : > { %s3209_s11 = scalar_lea.vmem %s253_s16, 4096  ;;  %p3217_p1 = scmp.lt.s32.totalorder %s253_s16, %s253_s16 }
  0x4a   : > { %p3210_p9 = scmp.ne.s32.totalorder %s253_s16, %s3209_s11  ;;  %p3218_p2 = scmp.lt.s32.totalorder %s3209_s11, %s3209_s11 }
  0x4c   : > { %p3212_p11 = pnand %p3210_p9, %p3447_p12  ;;  %p3219_p4 = por %p3218_p2, %p3217_p1 }
  0x4e   : > { %p3213_p13 = pneg %p3212_p11 }
  0x50   : > { %p3220_p8 = pnand %p3219_p4, %p3213_p13 }
  0x52   : > { %3223 = shalt.err (!%p3220_p8)
}
  0x53   : > { %s3335_s14 = smov 64   ;;  %s3336_s22 = smov 4  }
  0x54   : > { %2762 = dma.hbm_to_vmem [thread:$0]  (!%p3431_p10), %s3706_s5, 4096, %s253_s16, [#allocation9], %s3335_s14, %s3335_s14, %s3336_s22  }
  0x55   : > { %s3517_s18 = sadd.s32 1, %s3328_s27   ;;  %s32_s20 = sadd.s32 1, %s3324_s26 }
  0x56   : > { %s29_s19 = ssub.s32 %s3328_s27, %s3517_s18  ;;  %p39_p8 = scmp.ne.s32.totalorder %s3324_s26, %s3320_s25 }
  0x57   : > { %p30_p4 = scmp.eq.s32.totalorder %s29_s19, 0  ;;  %p40_p12 = scmp.eq.s32.totalorder %s3328_s27, 0 }
  0x58   : > { %p2774_p6 = scmp.lt.s32.totalorder %s3328_s27, 8  ;;  %p3719_p3 = scmp.eq.s32.totalorder %s3402_s28, 7 }
  0x59   : > { %s3527_s21 = scalar_select %p30_p4, %s3324_s26, %s32_s20  }
  0x5a   : > { %p41_p0 = por %p40_p12, %p39_p8  ;;  %p3531_p5 = por %p3719_p3, %p39_p8 }
  0x5b   : > { %s269_s12 = sand.u32 1, %s3324_s26   ;;  %s2647_s29 = sshll.u32 %s3328_s27, 10 }
  0x5c   : > { %s2406_s16 = sshll.u32 %s269_s12, 6  ;;  %s3540_s14 = scalar_lea.hbm %s3701_s0, %s2647_s29 }
  0x5d   : > { %s273_s22 = scalar_lea.vmem [#allocation2], %s2406_s16  ;;  %p3542_p10 = pnand %p2774_p6, %p41_p0 }
  0x5e   : > { %s281_s8 = sshll.u32 %s273_s22, 4  ;;  %s3548_s19 = scalar_lea.sflag [#allocation3], %s269_s12  ;;  %s3546_s8 = int_to_ptr.vmem [resolvable:$true] %s281_s8 }
  0x5f   : > { %s3224_s20 = scalar_lea.hbm %s3540_s14, 1024  ;;  %p3226_p9 = pneg %p3542_p10 }
  0x60   : > { %p3225_p7 = scmp.ne.s32.totalorder %s3540_s14, %s3224_s20  ;;  %s3229_s10 = scalar_lea.hbm %s3701_s0, 8192 }
  0x61   : > { %p3230_p1 = scmp.lt.u32.totalorder %s3540_s14, %s3701_s0  ;;  %p3231_p2 = scmp.lt.u32.totalorder %s3229_s10, %s3224_s20 }
  0x62   : > { %p3227_p11 = pnand %p3226_p9, %p3225_p7  ;;  %p3233_p8 = scmp.lt.u32.totalorder %s3224_s20, %s3540_s14 }
  0x63   : > { %p3232_p4 = por %p3231_p2, %p3230_p1 }
  0x64   : > { %p3228_p13 = pneg %p3227_p11 }
  0x65   : > { %p3234_p12 = por %p3233_p8, %p3232_p4 }
  0x67   : > { %p3235_p6 = pnand %p3234_p12, %p3228_p13 }
  0x69   : > { %3238 = shalt.err (!%p3235_p6)
}
  0x6a   : > { %s3239_s12 = scalar_lea.vmem %s3546_s8, 1024  ;;  %s3337_s29 = smov [#allocation2]  }
  0x6b   : > { %p3240_p0 = scmp.ne.s32.totalorder %s3546_s8, %s3239_s12  ;;  %s3244_s16 = sshll.u32 %s3337_s29, 4  ;;  %s3245_s16 = int_to_ptr.vmem [resolvable:$false] %s3244_s16 }
  0x6c   : > { %s3246_s11 = scalar_lea.vmem %s3245_s16, 2048  ;;  %p3247_p11 = scmp.lt.s32.totalorder %s3546_s8, %s3245_s16 }
  0x6d   : > { %p3242_p3 = pnand %p3240_p0, %p3226_p9  ;;  %p3248_p1 = scmp.lt.s32.totalorder %s3246_s11, %s3239_s12 }
  0x6f   : > { %p3243_p7 = pneg %p3242_p3  ;;  %p3249_p2 = por %p3248_p1, %p3247_p11 }
  0x71   : > { %p3250_p4 = pnand %p3249_p2, %p3243_p7 }
  0x73   : > { %3253 = shalt.err (!%p3250_p4)
}
  0x74   : > { %2766 = dma.hbm_to_vmem [thread:$0]  (!%p3542_p10), %s3540_s14, 1024, %s3546_s8, %s3548_s19, %s3333_s13, %s3333_s13, %s3334_s15  }
  0x75   : > { %p3722_p9 = scmp.ne.s32.totalorder %s3716_s9, 0 }
  0x76   : > { %s3582_s20 = sand.u32 (!%p3722_p9), 1, %s3320_s25   ;;  %p3723_p13 = scmp.ne.s32.totalorder (!%p3722_p9), %s3713_s30, 0 }
  0x77   : > { %293 = sbr.rel (%p3722_p9) target bundleno = 951 (0x3b7), region = 48  ;;  %s2411_s10 = sshll.u32 (!%p3722_p9), %s3582_s20, 6 }
  0x78   : > { %s296_s22 = scalar_lea.sflag (!%p3722_p9), [#allocation3], %s3582_s20  ;;  %s3586_s12 = scalar_lea.vmem (!%p3722_p9), [#allocation2], %s2411_s10 }
  0x7e   : > { %3299 = dma.done.wait (%p3723_p13), %s296_s22, 1024  }
  0x7f   : > { %3301 = vsyncadd (%p3723_p13), %s296_s22, 4294966272  ;;  %p3724_p10 = scmp.eq.s32.totalorder %s3402_s28, 0 }
  0x81   : > { %3303 = dma.done.wait (%p3724_p10), [#allocation6], 24576   ;;  %p3725_p8 = pmov %p3724_p10 }
  0x83   : > { %3305 = vsyncadd (%p3725_p8), [#allocation6], 4294942720  ;;  %p3726_p12 = pmov %p3725_p8 }
  0x84   : > { %p3727_p6 = pmov %p3725_p8 }
  0x85   : > { %3307 = dma.done.wait (%p3726_p12), [#allocation9], 4096  }
  0x86   : > { %3309 = vsyncadd (%p3727_p6), [#allocation9], 4294963200  ;;  %v2820_v0 = vld [vmem:[#allocation5 + $0x4] ss:$16 sps:$4 sm:$0xff]   ;;  %v2822_v1 = vld [vmem:[#allocation5] ss:$16 sps:$4 sm:$0xff]  }
  0x87   : > { %765 = vmatprep.subr.bf16.mxu0 %v2820_v0  ;;  %v2823_v2 = vld [vmem:[#allocation5 + $0x24] ss:$16 sps:$4 sm:$0xff]   ;;  %v2825_v3 = vld [vmem:[#allocation5 + $0x20] ss:$16 sps:$4 sm:$0xff]   ;;  %v2867_v13 = vld [vmem:[#allocation5 + $0xc] ss:$16 sps:$4 sm:$0xff]  }
  0x88   : > { %766 = vmatpush1.bf16.msra.mxu0 %v2822_v1  ;;  %v2826_v4 = vld [vmem:[#allocation5 + $0x44] ss:$16 sps:$4 sm:$0xff]   ;;  %v2828_v5 = vld [vmem:[#allocation5 + $0x40] ss:$16 sps:$4 sm:$0xff]   ;;  %v2870_v14 = vld [vmem:[#allocation5 + $0x8] ss:$16 sps:$4 sm:$0xff]   ;;  %818 = vmatprep.subr.bf16.mxu1 %v2867_v13 }
  0x89   : > { %767 = vmatprep.subr.bf16.mxu0 %v2823_v2  ;;  %v2829_v6 = vld [vmem:[#allocation5 + $0x64] ss:$16 sps:$4 sm:$0xff]   ;;  %v2831_v7 = vld [vmem:[#allocation5 + $0x60] ss:$16 sps:$4 sm:$0xff]   ;;  %v349_v15 = vld [vmem:[%s3586_s12 + $0x8] sm:$0xff]  ;;  %819 = vmatpush1.bf16.msra.mxu1 %v2870_v14  ;;  %s2415_s17 = sshll.u32 %s3582_s20, 5 }
  0x8a   : > { %v2832_v8 = vld [vmem:[#allocation5 + $0x84] ss:$16 sps:$4 sm:$0xff]   ;;  %v2834_v9 = vld [vmem:[#allocation5 + $0x80] ss:$16 sps:$4 sm:$0xff]   ;;  %v351_v18 = vld [vmem:[%s3586_s12 + $0x18] sm:$0xff]  ;;  %s341_s19 = scalar_lea.vmem [#allocation10], %s2415_s17 }
  0x8b   : > { %v2835_v10 = vld [vmem:[#allocation5 + $0xa4] ss:$16 sps:$4 sm:$0xff]   ;;  %v2837_v11 = vld [vmem:[#allocation5 + $0xa0] ss:$16 sps:$4 sm:$0xff]   ;;  %v357_v19 = vpack.c.bf16 %v351_v18, %v349_v15  ;;  %v2871_v20 = vld [vmem:[#allocation5 + $0x2c] ss:$16 sps:$4 sm:$0xff]  }
  0x8c   : > { %768 = vmatpush1.bf16.msra.mxu0 %v2825_v3  ;;  %v2838_v12 = vld [vmem:[#allocation5 + $0xc4] ss:$16 sps:$4 sm:$0xff]   ;;  %v2840_v16 = vld [vmem:[#allocation5 + $0xc0] ss:$16 sps:$4 sm:$0xff]   ;;  %v2873_v21 = vld [vmem:[#allocation5 + $0x28] ss:$16 sps:$4 sm:$0xff]   ;;  %820 = vmatprep.subr.bf16.mxu1 %v2871_v20 }
  0x8d   : > { %769 = vmatprep.subr.bf16.mxu0 %v2826_v4  ;;  %v2841_v17 = vld [vmem:[#allocation5 + $0xe4] ss:$16 sps:$4 sm:$0xff]   ;;  %797 = vmatprep.mubr.bf16.mxu0 %v357_v19  ;;  %v2874_v22 = vld [vmem:[#allocation5 + $0x4c] ss:$16 sps:$4 sm:$0xff]   ;;  %v2843_v23 = vld [vmem:[#allocation5 + $0xe0] ss:$16 sps:$4 sm:$0xff]  }
  0x8e   : > { %v2844_v24 = vld [vmem:[#allocation5 + $0x104] ss:$16 sps:$4 sm:$0xff]   ;;  %850 = vmatprep.mubr.bf16.mxu1 %v357_v19  ;;  %821 = vmatpush1.bf16.msra.mxu1 %v2873_v21  ;;  %v2876_v25 = vld [vmem:[#allocation5 + $0x48] ss:$16 sps:$4 sm:$0xff]   ;;  %v2877_v26 = vld [vmem:[#allocation5 + $0x6c] ss:$16 sps:$4 sm:$0xff]  }
  0x8f   : > { %822 = vmatprep.subr.bf16.mxu1 %v2874_v22  ;;  %v2846_v27 = vld [vmem:[#allocation5 + $0x100] ss:$16 sps:$4 sm:$0xff]   ;;  %v2847_v28 = vld [vmem:[#allocation5 + $0x124] ss:$16 sps:$4 sm:$0xff]   ;;  %v2879_v29 = vld [vmem:[#allocation5 + $0x68] ss:$16 sps:$4 sm:$0xff]  }
  0x90   : > { %770 = vmatpush1.bf16.msra.mxu0 %v2828_v5  ;;  %v2880_v30 = vld [vmem:[#allocation5 + $0x8c] ss:$16 sps:$4 sm:$0xff]   ;;  %v2849_v31 = vld [vmem:[#allocation5 + $0x120] ss:$16 sps:$4 sm:$0xff]   ;;  %v2850_v32 = vld [vmem:[#allocation5 + $0x144] ss:$16 sps:$4 sm:$0xff]  }
  0x91   : > { %771 = vmatprep.subr.bf16.mxu0 %v2829_v6  ;;  %v2882_v33 = vld [vmem:[#allocation5 + $0x88] ss:$16 sps:$4 sm:$0xff]   ;;  %v2883_v34 = vld [vmem:[#allocation5 + $0xac] ss:$16 sps:$4 sm:$0xff]   ;;  %v2852_v35 = vld [vmem:[#allocation5 + $0x140] ss:$16 sps:$4 sm:$0xff]  }
  0x92   : > { %823 = vmatpush1.bf16.msra.mxu1 %v2876_v25  ;;  %v2853_v36 = vld [vmem:[#allocation5 + $0x164] ss:$16 sps:$4 sm:$0xff]   ;;  %v2885_v37 = vld [vmem:[#allocation5 + $0xa8] ss:$16 sps:$4 sm:$0xff]   ;;  %v2886_v38 = vld [vmem:[#allocation5 + $0xcc] ss:$16 sps:$4 sm:$0xff]  }
  0x93   : > { %824 = vmatprep.subr.bf16.mxu1 %v2877_v26  ;;  %v2855_v39 = vld [vmem:[#allocation5 + $0x160] ss:$16 sps:$4 sm:$0xff]   ;;  %v2856_v40 = vld [vmem:[#allocation5 + $0x184] ss:$16 sps:$4 sm:$0xff]   ;;  %v2888_v41 = vld [vmem:[#allocation5 + $0xc8] ss:$16 sps:$4 sm:$0xff]  }
  0x94   : > { %772 = vmatpush1.bf16.msra.mxu0 %v2831_v7  ;;  %v2889_v42 = vld [vmem:[#allocation5 + $0xec] ss:$16 sps:$4 sm:$0xff]   ;;  %v2858_v43 = vld [vmem:[#allocation5 + $0x180] ss:$16 sps:$4 sm:$0xff]   ;;  %v2859_v44 = vld [vmem:[#allocation5 + $0x1a4] ss:$16 sps:$4 sm:$0xff]  }
  0x95   : > { %773 = vmatprep.subr.bf16.mxu0 %v2832_v8  ;;  %v2891_v45 = vld [vmem:[#allocation5 + $0xe8] ss:$16 sps:$4 sm:$0xff]   ;;  %v2892_v46 = vld [vmem:[#allocation5 + $0x10c] ss:$16 sps:$4 sm:$0xff]   ;;  %v2861_v47 = vld [vmem:[#allocation5 + $0x1a0] ss:$16 sps:$4 sm:$0xff]  }
  0x96   : > { %825 = vmatpush1.bf16.msra.mxu1 %v2879_v29  ;;  %v2862_v48 = vld [vmem:[#allocation5 + $0x1c4] ss:$16 sps:$4 sm:$0xff]   ;;  %v2894_v49 = vld [vmem:[#allocation5 + $0x108] ss:$16 sps:$4 sm:$0xff]   ;;  %v2895_v50 = vld [vmem:[#allocation5 + $0x12c] ss:$16 sps:$4 sm:$0xff]  }
  0x97   : > { %826 = vmatprep.subr.bf16.mxu1 %v2880_v30  ;;  %v2864_v51 = vld [vmem:[#allocation5 + $0x1c0] ss:$16 sps:$4 sm:$0xff]   ;;  %v2865_v52 = vld [vmem:[#allocation5 + $0x1e4] ss:$16 sps:$4 sm:$0xff]   ;;  %v2897_v53 = vld [vmem:[#allocation5 + $0x128] ss:$16 sps:$4 sm:$0xff]  }
  0x98   : > { %774 = vmatpush1.bf16.msra.mxu0 %v2834_v9  ;;  %v2869_v54 = vld [vmem:[#allocation5 + $0x1e0] ss:$16 sps:$4 sm:$0xff]   ;;  %v2898_v56 = vld [vmem:[#allocation5 + $0x14c] ss:$16 sps:$4 sm:$0xff]   ;;  %v2900_v58 = vld [vmem:[#allocation5 + $0x148] ss:$16 sps:$4 sm:$0xff]  }
  0x99   : > { %775 = vmatprep.subr.bf16.mxu0 %v2835_v10  ;;  %v348_v55 = vld [vmem:[%s3586_s12] sm:$0xff]  ;;  %v350_v57 = vld [vmem:[%s3586_s12 + $0x10] sm:$0xff]  ;;  %v353_v59 = vld [vmem:[%s3586_s12 + $0x28] sm:$0xff]  ;;  %s2298_s29 = sshll.u32 %s341_s19, 4  ;;  %s2648_s16 = sshll.u32 %s3402_s28, 9  ;;  %s3653_s29 = int_to_ptr.vmem [resolvable:$true] %s2298_s29 }
  0x9a   : > { %827 = vmatpush1.bf16.msra.mxu1 %v2882_v33  ;;  %v355_v60 = vld [vmem:[%s3586_s12 + $0x38] sm:$0xff]  ;;  %v2918_v61 = vld [vmem:[#allocation7 + $0x4] ss:$16 sps:$4 sm:$0xff]   ;;  %v356_v63 = vpack.c.bf16 %v350_v57, %v348_v55  ;;  %v2916_v2 = vld [vmem:[#allocation7] ss:$16 sps:$4 sm:$0xff]   ;;  %s3658_s22 = scalar_lea.hbm %s3708_s7, %s2648_s16  ;;  %s3254_s30 = scalar_lea.vmem %s3653_s29, 512 }
  0x9b   : > { %828 = vmatprep.subr.bf16.mxu1 %v2883_v34  ;;  %v2901_v62 = vld [vmem:[#allocation5 + $0x16c] ss:$16 sps:$4 sm:$0xff]   ;;  %v2903_v0 = vld [vmem:[#allocation5 + $0x168] ss:$16 sps:$4 sm:$0xff]   ;;  %v359_v1 = vpack.c.bf16 %v355_v60, %v353_v59  ;;  %v2924_v3 = vld [vmem:[#allocation7 + $0x24] ss:$16 sps:$4 sm:$0xff]   ;;  %p3255_p0 = scmp.ne.s32.totalorder %s3653_s29, %s3254_s30 }
  0x9c   : > { %776 = vmatpush1.bf16.msra.mxu0 %v2837_v11  ;;  %v2904_v4 = vld [vmem:[#allocation5 + $0x18c] ss:$16 sps:$4 sm:$0xff]   ;;  %v2906_v5 = vld [vmem:[#allocation5 + $0x188] ss:$16 sps:$4 sm:$0xff]   ;;  %v352_v6 = vld [vmem:[%s3586_s12 + $0x20] sm:$0xff]  ;;  %s3338_s28 = smov [#allocation10]  }
  0x9d   : > { %777 = vmatprep.subr.bf16.mxu0 %v2838_v12  ;;  %v354_v7 = vld [vmem:[%s3586_s12 + $0x30] sm:$0xff]  ;;  %v2907_v10 = vld [vmem:[#allocation5 + $0x1ac] ss:$16 sps:$4 sm:$0xff]   ;;  %v2909_v12 = vld [vmem:[#allocation5 + $0x1a8] ss:$16 sps:$4 sm:$0xff]   ;;  %s2285_s12 = scalar_lea.sflag [#allocation4], %s3582_s20  ;;  %p3256_p3 = pnand %p3255_p0, %p3531_p5 }
  0x9e   : > { %829 = vmatpush1.bf16.msra.mxu1 %v2885_v37  ;;  %v2922_v8 = vld [vmem:[#allocation7 + $0x20] ss:$16 sps:$4 sm:$0xff]   ;;  %v2930_v9 = vld [vmem:[#allocation7 + $0x44] ss:$16 sps:$4 sm:$0xff]   ;;  %v358_v11 = vpack.c.bf16 %v354_v7, %v352_v6  ;;  %v2910_v15 = vld [vmem:[#allocation5 + $0x1cc] ss:$16 sps:$4 sm:$0xff]  }
  0x9f   : > { %830 = vmatprep.subr.bf16.mxu1 %v2886_v38  ;;  %v2928_v13 = vld [vmem:[#allocation7 + $0x40] ss:$16 sps:$4 sm:$0xff]   ;;  %v2936_v14 = vld [vmem:[#allocation7 + $0x64] ss:$16 sps:$4 sm:$0xff]   ;;  %v2913_v19 = vld [vmem:[#allocation5 + $0x1ec] ss:$16 sps:$4 sm:$0xff]   ;;  %p3257_p7 = pneg %p3256_p3 }
  0xa0   : > { %778 = vmatpush1.bf16.msra.mxu0 %v2840_v16  ;;  %v2912_v16 = vld [vmem:[#allocation5 + $0x1c8] ss:$16 sps:$4 sm:$0xff]   ;;  %v2942_v18 = vld [vmem:[#allocation7 + $0x84] ss:$16 sps:$4 sm:$0xff]   ;;  %v2940_v21 = vld [vmem:[#allocation7 + $0x80] ss:$16 sps:$4 sm:$0xff]  }
  0xa1   : > { %779 = vmatprep.subr.bf16.mxu0 %v2841_v17  ;;  %v2934_v17 = vld [vmem:[#allocation7 + $0x60] ss:$16 sps:$4 sm:$0xff]   ;;  %v2915_v20 = vld [vmem:[#allocation5 + $0x1e8] ss:$16 sps:$4 sm:$0xff]   ;;  %v2948_v22 = vld [vmem:[#allocation7 + $0xa4] ss:$16 sps:$4 sm:$0xff]  }
  0xa2   : > { %831 = vmatpush1.bf16.msra.mxu1 %v2888_v41  ;;  %v2946_v25 = vld [vmem:[#allocation7 + $0xa0] ss:$16 sps:$4 sm:$0xff]   ;;  %v2927_v26 = vld [vmem:[#allocation7 + $0x2c] ss:$16 sps:$4 sm:$0xff]   ;;  %v2925_v29 = vld [vmem:[#allocation7 + $0x28] ss:$16 sps:$4 sm:$0xff]  }
  0xa3   : > { %832 = vmatprep.subr.bf16.mxu1 %v2889_v42  ;;  %v2960_v30 = vld [vmem:[#allocation7 + $0xe4] ss:$16 sps:$4 sm:$0xff]   ;;  %v2931_v33 = vld [vmem:[#allocation7 + $0x48] ss:$16 sps:$4 sm:$0xff]   ;;  %v2969_v55 = vld [vmem:[#allocation7 + $0x10c] ss:$16 sps:$4 sm:$0xff]  }
  0xa4   : > { %780 = vmatpush1.bf16.msra.mxu0 %v2843_v23  ;;  %v2921_v23 = vld [vmem:[#allocation7 + $0xc] ss:$16 sps:$4 sm:$0xff]   ;;  %v2966_v34 = vld [vmem:[#allocation7 + $0x104] ss:$16 sps:$4 sm:$0xff]   ;;  %v2937_v37 = vld [vmem:[#allocation7 + $0x68] ss:$16 sps:$4 sm:$0xff]  }
  0xa5   : > { %781 = vmatprep.subr.bf16.mxu0 %v2844_v24  ;;  %v2919_v24 = vld [vmem:[#allocation7 + $0x8] ss:$16 sps:$4 sm:$0xff]   ;;  %v2972_v38 = vld [vmem:[#allocation7 + $0x124] ss:$16 sps:$4 sm:$0xff]   ;;  %v2981_v60 = vld [vmem:[#allocation7 + $0x14c] ss:$16 sps:$4 sm:$0xff]  }
  0xa6   : > { %833 = vmatpush1.bf16.msra.mxu1 %v2891_v45  ;;  %v2943_v41 = vld [vmem:[#allocation7 + $0x88] ss:$16 sps:$4 sm:$0xff]   ;;  %v2978_v42 = vld [vmem:[#allocation7 + $0x144] ss:$16 sps:$4 sm:$0xff]   ;;  %v3000_v6 = vld [vmem:[#allocation7 + $0x1c0] ss:$16 sps:$4 sm:$0xff]  }
  0xa7   : > { %834 = vmatprep.subr.bf16.mxu1 %v2892_v46  ;;  %v2949_v45 = vld [vmem:[#allocation7 + $0xa8] ss:$16 sps:$4 sm:$0xff]   ;;  %v2984_v46 = vld [vmem:[#allocation7 + $0x164] ss:$16 sps:$4 sm:$0xff]   ;;  %s3258_s9 = sshll.u32 %s3338_s28, 4  ;;  %s3259_s9 = int_to_ptr.vmem [resolvable:$false] %s3258_s9 }
  0xa8   : > { %782 = vmatpush1.bf16.msra.mxu0 %v2846_v27  ;;  %v2954_v27 = vld [vmem:[#allocation7 + $0xc4] ss:$16 sps:$4 sm:$0xff]   ;;  %v2967_v57 = vld [vmem:[#allocation7 + $0x108] ss:$16 sps:$4 sm:$0xff]   ;;  %s3260_s13 = scalar_lea.vmem %s3259_s9, 1024  ;;  %p3261_p11 = scmp.lt.s32.totalorder %s3653_s29, %s3259_s9 }
  0xa9   : > { %783 = vmatprep.subr.bf16.mxu0 %v2847_v28  ;;  %v2952_v28 = vld [vmem:[#allocation7 + $0xc0] ss:$16 sps:$4 sm:$0xff]   ;;  %v2973_v59 = vld [vmem:[#allocation7 + $0x128] ss:$16 sps:$4 sm:$0xff]   ;;  %p3262_p1 = scmp.lt.s32.totalorder %s3260_s13, %s3254_s30 }
  0xaa   : > { %835 = vmatpush1.bf16.msra.mxu1 %v2894_v49  ;;  %v2955_v49 = vld [vmem:[#allocation7 + $0xc8] ss:$16 sps:$4 sm:$0xff]  }
  0xab   : > { %836 = vmatprep.subr.bf16.mxu1 %v2895_v50  ;;  %v2990_v50 = vld [vmem:[#allocation7 + $0x184] ss:$16 sps:$4 sm:$0xff]   ;;  %v3003_v7 = vld [vmem:[#allocation7 + $0x1c8] ss:$16 sps:$4 sm:$0xff]   ;;  %p3263_p2 = por %p3262_p1, %p3261_p11 }
  0xac   : > { %784 = vmatpush1.bf16.msra.mxu0 %v2849_v31  ;;  %v2933_v31 = vld [vmem:[#allocation7 + $0x4c] ss:$16 sps:$4 sm:$0xff]  }
  0xad   : > { %785 = vmatprep.subr.bf16.mxu0 %v2850_v32  ;;  %v2958_v32 = vld [vmem:[#allocation7 + $0xe0] ss:$16 sps:$4 sm:$0xff]   ;;  %p3264_p4 = pnand %p3263_p2, %p3257_p7 }
  0xae   : > { %837 = vmatpush1.bf16.msra.mxu1 %v2897_v53  ;;  %v2961_v53 = vld [vmem:[#allocation7 + $0xe8] ss:$16 sps:$4 sm:$0xff]  }
  0xaf   : > { %838 = vmatprep.subr.bf16.mxu1 %v2898_v56  ;;  %v2994_v56 = vld [vmem:[#allocation7 + $0x1a0] ss:$16 sps:$4 sm:$0xff]  }
  0xb0   : > { %786 = vmatpush1.bf16.msra.mxu0 %v2852_v35  ;;  %v2939_v35 = vld [vmem:[#allocation7 + $0x6c] ss:$16 sps:$4 sm:$0xff]  }
  0xb1   : > { %787 = vmatprep.subr.bf16.mxu0 %v2853_v36  ;;  %v2964_v36 = vld [vmem:[#allocation7 + $0x100] ss:$16 sps:$4 sm:$0xff]  }
  0xb2   : > { %839 = vmatpush1.bf16.msra.mxu1 %v2900_v58  ;;  %v2975_v58 = vld [vmem:[#allocation7 + $0x12c] ss:$16 sps:$4 sm:$0xff]  }
  0xb3   : > { %840 = vmatprep.subr.bf16.mxu1 %v2901_v62  ;;  %v2987_v62 = vld [vmem:[#allocation7 + $0x16c] ss:$16 sps:$4 sm:$0xff]  }
  0xb4   : > { %788 = vmatpush1.bf16.msra.mxu0 %v2855_v39  ;;  %v2945_v39 = vld [vmem:[#allocation7 + $0x8c] ss:$16 sps:$4 sm:$0xff]  }
  0xb5   : > { %789 = vmatprep.subr.bf16.mxu0 %v2856_v40  ;;  %v2970_v40 = vld [vmem:[#allocation7 + $0x120] ss:$16 sps:$4 sm:$0xff]  }
  0xb6   : > { %841 = vmatpush1.bf16.msra.mxu1 %v2903_v0  ;;  %v2993_v0 = vld [vmem:[#allocation7 + $0x18c] ss:$16 sps:$4 sm:$0xff]  }
  0xb7   : > { %842 = vmatprep.subr.bf16.mxu1 %v2904_v4  ;;  %v3002_v4 = vld [vmem:[#allocation7 + $0x1c4] ss:$16 sps:$4 sm:$0xff]  }
  0xb8   : > { %790 = vmatpush1.bf16.msra.mxu0 %v2858_v43  ;;  %v2951_v43 = vld [vmem:[#allocation7 + $0xac] ss:$16 sps:$4 sm:$0xff]  }
  0xb9   : > { %791 = vmatprep.subr.bf16.mxu0 %v2859_v44  ;;  %v2976_v44 = vld [vmem:[#allocation7 + $0x140] ss:$16 sps:$4 sm:$0xff]  }
  0xba   : > { %843 = vmatpush1.bf16.msra.mxu1 %v2906_v5  ;;  %v3005_v5 = vld [vmem:[#allocation7 + $0x1cc] ss:$16 sps:$4 sm:$0xff]  }
  0xbb   : > { %844 = vmatprep.subr.bf16.mxu1 %v2907_v10  ;;  %v3006_v10 = vld [vmem:[#allocation7 + $0x1e0] ss:$16 sps:$4 sm:$0xff]  }
  0xbc   : > { %792 = vmatpush1.bf16.msra.mxu0 %v2861_v47  ;;  %v2957_v47 = vld [vmem:[#allocation7 + $0xcc] ss:$16 sps:$4 sm:$0xff]  }
  0xbd   : > { %793 = vmatprep.subr.bf16.mxu0 %v2862_v48  ;;  %v2982_v48 = vld [vmem:[#allocation7 + $0x160] ss:$16 sps:$4 sm:$0xff]  }
  0xbe   : > { %845 = vmatpush1.bf16.msra.mxu1 %v2909_v12  ;;  %v3014_v12 = vld [vmem:[#allocation7 + $0x204] ss:$16 sps:$4 sm:$0xff]  }
  0xbf   : > { %846 = vmatprep.subr.bf16.mxu1 %v2910_v15 }
  0xc0   : > { %794 = vmatpush1.bf16.msra.mxu0 %v2864_v51  ;;  %v2963_v51 = vld [vmem:[#allocation7 + $0xec] ss:$16 sps:$4 sm:$0xff]  }
  0xc1   : > { %795 = vmatprep.subr.bf16.mxu0 %v2865_v52  ;;  %v2988_v52 = vld [vmem:[#allocation7 + $0x180] ss:$16 sps:$4 sm:$0xff]  }
  0xc2   : > { %847 = vmatpush1.bf16.msra.mxu1 %v2912_v16 }
  0xc3   : > { %848 = vmatprep.subr.bf16.mxu1 %v2913_v19 }
  0xc4   : > { %796 = vmatpush1.bf16.msra.mxu0 %v2869_v54  ;;  %v2996_v54 = vld [vmem:[#allocation7 + $0x1a4] ss:$16 sps:$4 sm:$0xff]  }
  0xc5   : > { %1684 = vmatprep.subr.bf16.mxu0 %v2918_v61  ;;  %v2979_v61 = vld [vmem:[#allocation7 + $0x148] ss:$16 sps:$4 sm:$0xff]  }
  0xc6   : > { %849 = vmatpush1.bf16.msra.mxu1 %v2915_v20 }
  0xc7   : > { %798 = vmatmul.mubr.bf16.vlgmr.msra.gmra.mrb[0].mxu0 %v356_v63  ;;  %1790 = vmatprep.subr.bf16.mxu1 %v2921_v23 }
  0xc8   : > { %807 = vmatprep.mubr.bf16.mxu0 %v359_v1  ;;  %1685 = vmatpush1.bf16.msra.mxu0 %v2916_v2  ;;  %v2999_v2 = vld [vmem:[#allocation7 + $0x1ac] ss:$16 sps:$4 sm:$0xff]  }
  0xc9   : > { %1686 = vmatprep.subr.bf16.mxu0 %v2924_v3  ;;  %851 = vmatmul.mubr.bf16.vlgmr.msra.gmra.mrb[0].mxu1 %v356_v63  ;;  %v2985_v63 = vld [vmem:[#allocation7 + $0x168] ss:$16 sps:$4 sm:$0xff]  }
  0xca   : > { %860 = vmatprep.mubr.bf16.mxu1 %v359_v1  ;;  %1791 = vmatpush1.bf16.msra.mxu1 %v2919_v24  ;;  %v2991_v1 = vld [vmem:[#allocation7 + $0x188] ss:$16 sps:$4 sm:$0xff]  }
  0xcb   : > { %1792 = vmatprep.subr.bf16.mxu1 %v2927_v26  ;;  %v2997_v3 = vld [vmem:[#allocation7 + $0x1a8] ss:$16 sps:$4 sm:$0xff]  }
  0xcc   : > { %1687 = vmatpush1.bf16.msra.mxu0 %v2922_v8  ;;  %v3008_v8 = vld [vmem:[#allocation7 + $0x1e4] ss:$16 sps:$4 sm:$0xff]  }
  0xcd   : > { %1688 = vmatprep.subr.bf16.mxu0 %v2930_v9  ;;  %v3011_v9 = vld [vmem:[#allocation7 + $0x1ec] ss:$16 sps:$4 sm:$0xff]  }
  0xce   : > { %1793 = vmatpush1.bf16.msra.mxu1 %v2925_v29 }
  0xcf   : > { %808 = vmatmul.mubr.bf16.gmra.mrb[4].mxu0 %v358_v11  ;;  %1794 = vmatprep.subr.bf16.mxu1 %v2933_v31 }
  0xd0   : > { %1689 = vmatpush1.bf16.msra.mxu0 %v2928_v13  ;;  %v3017_v13 = vld [vmem:[#allocation7 + $0x20c] ss:$16 sps:$4 sm:$0xff]  }
  0xd1   : > { %1690 = vmatprep.subr.bf16.mxu0 %v2936_v14  ;;  %861 = vmatmul.mubr.bf16.gmra.mrb[4].mxu1 %v358_v11  ;;  %v3009_v11 = vld [vmem:[#allocation7 + $0x1e8] ss:$16 sps:$4 sm:$0xff]   ;;  %v425_v14 = vlaneseq }
  0xd2   : > { %1795 = vmatpush1.bf16.msra.mxu1 %v2931_v33 }
  0xd3   : > { %1796 = vmatprep.subr.bf16.mxu1 %v2939_v35  ;;  %v3608_v15 = vshrl.u32 %v425_v14, 7  ;;  %v3012_v35 = vld [vmem:[#allocation7 + $0x200] ss:$16 sps:$4 sm:$0xff]  }
  0xd4   : > { %1691 = vmatpush1.bf16.msra.mxu0 %v2934_v17  ;;  %v345_v17 = vld [vmem:[%s3703_s2] sm:$0xf] }
  0xd5   : > { %1692 = vmatprep.subr.bf16.mxu0 %v2942_v18  ;;  %v427_v16 = vsub.s32 0, %v3608_v15  ;;  %v431_v18 = vsub.s32 1, %v3608_v15 }
  0xd6   : > { %1797 = vmatpush1.bf16.msra.mxu1 %v2937_v37 }
  0xd7   : > { %1798 = vmatprep.subr.bf16.mxu1 %v2945_v39  ;;  %v428_v19 = vrot.slane %v345_v17, %v427_v16  ;;  %v432_v20 = vrot.slane %v345_v17, %v431_v18  ;;  %v3023_v39 = vld [vmem:[#allocation7 + $0x22c] ss:$16 sps:$4 sm:$0xff]  }
  0xd8   : > { %1693 = vmatpush1.bf16.msra.mxu0 %v2940_v21 }
  0xd9   : > { %1694 = vmatprep.subr.bf16.mxu0 %v2948_v22 }
  0xda   : > { %1799 = vmatpush1.bf16.msra.mxu1 %v2943_v41 }
  0xdb   : > { %1800 = vmatprep.subr.bf16.mxu1 %v2951_v43 }
  0xdc   : > { %1695 = vmatpush1.bf16.msra.mxu0 %v2946_v25 }
  0xdd   : > { %1696 = vmatprep.subr.bf16.mxu0 %v2954_v27 }
  0xde   : > { %1801 = vmatpush1.bf16.msra.mxu1 %v2949_v45 }
  0xdf   : > { %1802 = vmatprep.subr.bf16.mxu1 %v2957_v47  ;;  %v3018_v47 = vld [vmem:[#allocation7 + $0x220] ss:$16 sps:$4 sm:$0xff]  }
  0xe0   : > { %1697 = vmatpush1.bf16.msra.mxu0 %v2952_v28 }
  0xe1   : > { %1698 = vmatprep.subr.bf16.mxu0 %v2960_v30 }
  0xe2   : > { %1803 = vmatpush1.bf16.msra.mxu1 %v2955_v49 }
  0xe3   : > { %1804 = vmatprep.subr.bf16.mxu1 %v2963_v51  ;;  %v3026_v51 = vld [vmem:[#allocation7 + $0x244] ss:$16 sps:$4 sm:$0xff]  }
  0xe4   : > { %1699 = vmatpush1.bf16.msra.mxu0 %v2958_v32 }
  0xe5   : > { %1700 = vmatprep.subr.bf16.mxu0 %v2966_v34 }
  0xe6   : > { %1805 = vmatpush1.bf16.msra.mxu1 %v2961_v53 }
  0xe7   : > { %1806 = vmatprep.subr.bf16.mxu1 %v2969_v55  ;;  %v435_v55 = vsub.s32 2, %v3608_v15 }
  0xe8   : > { %1701 = vmatpush1.bf16.msra.mxu0 %v2964_v36  ;;  %v3015_v36 = vld [vmem:[#allocation7 + $0x208] ss:$16 sps:$4 sm:$0xff]  }
  0xe9   : > { %1702 = vmatprep.subr.bf16.mxu0 %v2972_v38  ;;  %v3020_v38 = vld [vmem:[#allocation7 + $0x224] ss:$16 sps:$4 sm:$0xff]  }
  0xea   : > { %1807 = vmatpush1.bf16.msra.mxu1 %v2967_v57  ;;  %v439_v57 = vsub.s32 3, %v3608_v15 }
  0xeb   : > { %1808 = vmatprep.subr.bf16.mxu1 %v2975_v58  ;;  %v3024_v58 = vld [vmem:[#allocation7 + $0x240] ss:$16 sps:$4 sm:$0xff]  }
  0xec   : > { %1703 = vmatpush1.bf16.msra.mxu0 %v2970_v40 }
  0xed   : > { %1704 = vmatprep.subr.bf16.mxu0 %v2978_v42 }
  0xee   : > { %1809 = vmatpush1.bf16.msra.mxu1 %v2973_v59  ;;  %v3027_v59 = vld [vmem:[#allocation7 + $0x248] ss:$16 sps:$4 sm:$0xff]  }
  0xef   : > { %1810 = vmatprep.subr.bf16.mxu1 %v2981_v60 }
  0xf0   : > { %1705 = vmatpush1.bf16.msra.mxu0 %v2976_v44 }
  0xf1   : > { %1706 = vmatprep.subr.bf16.mxu0 %v2984_v46 }
  0xf2   : > { %1811 = vmatpush1.bf16.msra.mxu1 %v2979_v61  ;;  %v3032_v61 = vld [vmem:[#allocation7 + $0x264] ss:$16 sps:$4 sm:$0xff]  }
  0xf3   : > { %1812 = vmatprep.subr.bf16.mxu1 %v2987_v62  ;;  %v3035_v62 = vld [vmem:[#allocation7 + $0x26c] ss:$16 sps:$4 sm:$0xff]  }
  0xf4   : > { %1707 = vmatpush1.bf16.msra.mxu0 %v2982_v48  ;;  %v3021_v48 = vld [vmem:[#allocation7 + $0x228] ss:$16 sps:$4 sm:$0xff]  }
  0xf5   : > { %1708 = vmatprep.subr.bf16.mxu0 %v2990_v50 }
  0xf6   : > { %1813 = vmatpush1.bf16.msra.mxu1 %v2985_v63  ;;  %v436_v63 = vrot.slane %v345_v17, %v435_v55 }
  0xf7   : > { %1814 = vmatprep.subr.bf16.mxu1 %v2993_v0  ;;  %v440_v0 = vrot.slane %v345_v17, %v439_v57  ;;  %v3044_v17 = vld [vmem:[#allocation7 + $0x2a4] ss:$16 sps:$4 sm:$0xff]  }
  0xf8   : > { %1709 = vmatpush1.bf16.msra.mxu0 %v2988_v52  ;;  %v3029_v52 = vld [vmem:[#allocation7 + $0x24c] ss:$16 sps:$4 sm:$0xff]  }
  0xf9   : > { %1710 = vmatprep.subr.bf16.mxu0 %v2996_v54 }
  0xfa   : > { %1815 = vmatpush1.bf16.msra.mxu1 %v2991_v1  ;;  %v3030_v1 = vld [vmem:[#allocation7 + $0x260] ss:$16 sps:$4 sm:$0xff]  }
  0xfb   : > { %1816 = vmatprep.subr.bf16.mxu1 %v2999_v2  ;;  %v3033_v2 = vld [vmem:[#allocation7 + $0x268] ss:$16 sps:$4 sm:$0xff]  }
  0xfc   : > { %1711 = vmatpush1.bf16.msra.mxu0 %v2994_v56 }
  0xfd   : > { %1712 = vmatprep.subr.bf16.mxu0 %v3002_v4  ;;  %v3041_v4 = vld [vmem:[#allocation7 + $0x28c] ss:$16 sps:$4 sm:$0xff]  }
  0xfe   : > { %1817 = vmatpush1.bf16.msra.mxu1 %v2997_v3  ;;  %v3038_v3 = vld [vmem:[#allocation7 + $0x284] ss:$16 sps:$4 sm:$0xff]  }
  0xff   : > { %1818 = vmatprep.subr.bf16.mxu1 %v3005_v5 }
 0x100   : > { %1713 = vmatpush1.bf16.msra.mxu0 %v3000_v6 }
 0x101   : > { %1714 = vmatprep.subr.bf16.mxu0 %v3008_v8 }
 0x102   : > { %1819 = vmatpush1.bf16.msra.mxu1 %v3003_v7 }
 0x103   : > { %1820 = vmatprep.subr.bf16.mxu1 %v3011_v9 }
 0x104   : > { %1715 = vmatpush1.bf16.msra.mxu0 %v3006_v10  ;;  %v3036_v10 = vld [vmem:[#allocation7 + $0x280] ss:$16 sps:$4 sm:$0xff]  }
 0x105   : > { %1737 = vmatprep.subr.bf16.mxu0 %v3014_v12 }
 0x106   : > { %1821 = vmatpush1.bf16.msra.mxu1 %v3009_v11  ;;  %v3039_v11 = vld [vmem:[#allocation7 + $0x288] ss:$16 sps:$4 sm:$0xff]  }
 0x107   : > { %1843 = vmatprep.subr.bf16.mxu1 %v3017_v13 }
 0x19a   : > { %v799_v21 = vpop.f32.mrb[0].mxu0 }
 0x19b   : > { %v800_v22 = vadd.f32 %v799_v21, %v428_v19  ;;  %v801_v23 = vpop.f32.mrb[1].mxu0 }
 0x19c   : > { %v802_v24 = vadd.f32 %v801_v23, %v432_v20  ;;  %v803_v25 = vpop.f32.mrb[2].mxu0  ;;  %v852_v5 = vpop.f32.mrb[0].mxu1 }
 0x19d   : > { %v804_v26 = vadd.f32 %v803_v25, %v428_v19  ;;  %v805_v27 = vpop.f32.mrb[3].mxu0  ;;  %v871_v29 = vmax.f32 %v800_v22, 0.0  ;;  %v853_v6 = vadd.f32 %v852_v5, %v436_v63  ;;  %v854_v7 = vpop.f32.mrb[1].mxu1  ;;  %v3045_v25 = vld [vmem:[#allocation7 + $0x2a8] ss:$16 sps:$4 sm:$0xff]  }
 0x19e   : > { %v806_v28 = vadd.f32 %v805_v27, %v432_v20  ;;  %v872_v31 = vmax.f32 %v802_v24, 0.0  ;;  %v855_v8 = vadd.f32 %v854_v7, %v440_v0  ;;  %v856_v9 = vpop.f32.mrb[2].mxu1  ;;  %v3042_v24 = vld [vmem:[#allocation7 + $0x2a0] ss:$16 sps:$4 sm:$0xff]   ;;  %v3050_v27 = vld [vmem:[#allocation7 + $0x2c4] ss:$16 sps:$4 sm:$0xff]  }
 0x19f   : > { %v875_v30 = vmax.f32 %v804_v26, 0.0  ;;  %v873_v12 = vmax.f32 %v853_v6, 0.0  ;;  %v857_v13 = vadd.f32 %v856_v9, %v436_v63  ;;  %v858_v14 = vpop.f32.mrb[3].mxu1  ;;  %v3089_v5 = vld [vmem:[#allocation7 + $0x38c] ss:$16 sps:$4 sm:$0xff]  }
 0x1a0   : > { %v876_v32 = vmax.f32 %v806_v28, 0.0  ;;  %v859_v21 = vadd.f32 %v858_v14, %v440_v0  ;;  %v3053_v28 = vld [vmem:[#allocation7 + $0x2cc] ss:$16 sps:$4 sm:$0xff]   ;;  %v3084_v6 = vld [vmem:[#allocation7 + $0x380] ss:$16 sps:$4 sm:$0xff]  }
 0x1a1   : > { %v887_v33 = vpack.c.bf16 %v875_v30, %v871_v29  ;;  %v877_v22 = vmax.f32 %v857_v13, 0.0  ;;  %v3087_v7 = vld [vmem:[#allocation7 + $0x388] ss:$16 sps:$4 sm:$0xff]   ;;  %v3095_v9 = vld [vmem:[#allocation7 + $0x3ac] ss:$16 sps:$4 sm:$0xff]  }
 0x1a2   : > { %v888_v34 = vpack.c.bf16 %v876_v32, %v872_v31  ;;  %v809_v37 = vpop.f32.mrb[4].mxu0  ;;  %v878_v23 = vmax.f32 %v859_v21, 0.0  ;;  %v3101_v13 = vld [vmem:[#allocation7 + $0x3cc] ss:$16 sps:$4 sm:$0xff]   ;;  %v3096_v14 = vld [vmem:[#allocation7 + $0x3c0] ss:$16 sps:$4 sm:$0xff]  }
 0x1a3   : > { %v810_v40 = vadd.f32 %v809_v37, %v428_v19  ;;  %v811_v41 = vpop.f32.mrb[5].mxu0  ;;  %v3625_v26 = vpack.c.bf16 %v877_v22, %v873_v12  ;;  %v3098_v12 = vld [vmem:[#allocation7 + $0x3c4] ss:$16 sps:$4 sm:$0xff]   ;;  %v3102_v21 = vld [vmem:[#allocation7 + $0x3e0] ss:$16 sps:$4 sm:$0xff]  }
 0x1a4   : > { %1716 = vmatprep.mubr.bf16.mxu0 %v888_v34  ;;  %1822 = vmatprep.mubr.bf16.mxu1 %v888_v34  ;;  %v812_v42 = vadd.f32 %v811_v41, %v432_v20  ;;  %v813_v43 = vpop.f32.mrb[6].mxu0  ;;  %v862_v30 = vpop.f32.mrb[4].mxu1  ;;  %v3059_v41 = vld [vmem:[#allocation7 + $0x2ec] ss:$16 sps:$4 sm:$0xff]   ;;  %v3105_v22 = vld [vmem:[#allocation7 + $0x3e8] ss:$16 sps:$4 sm:$0xff]  }
 0x1a5   : > { %1717 = vmatmul.mubr.bf16.vlgmr.msra.gmra.mrb[8].mxu0 %v887_v33  ;;  %1823 = vmatmul.mubr.bf16.vlgmr.msra.gmra.mrb[8].mxu1 %v887_v33  ;;  %v879_v44 = vmax.f32 %v810_v40, 0.0  ;;  %v814_v45 = vadd.f32 %v813_v43, %v428_v19  ;;  %v815_v46 = vpop.f32.mrb[7].mxu0  ;;  %v3047_v19 = vld [vmem:[#allocation7 + $0x2ac] ss:$16 sps:$4 sm:$0xff]   ;;  %v863_v31 = vadd.f32 %v862_v30, %v436_v63  ;;  %v864_v32 = vpop.f32.mrb[5].mxu1 }
 0x1a6   : > { %1738 = vmatpush1.bf16.msra.mxu0 %v3012_v35  ;;  %1844 = vmatpush1.bf16.msra.mxu1 %v3015_v36  ;;  %v880_v49 = vmax.f32 %v812_v42, 0.0  ;;  %v816_v50 = vadd.f32 %v815_v46, %v432_v20  ;;  %v874_v20 = vmax.f32 %v855_v8, 0.0  ;;  %v865_v33 = vadd.f32 %v864_v32, %v440_v0  ;;  %v866_v34 = vpop.f32.mrb[6].mxu1  ;;  %v3048_v35 = vld [vmem:[#allocation7 + $0x2c0] ss:$16 sps:$4 sm:$0xff]   ;;  %v3114_v30 = vld [vmem:[#allocation8 + $0x8] sm:$0xff]  }
 0x1a7   : > { %1739 = vmatprep.subr.bf16.mxu0 %v3020_v38  ;;  %1845 = vmatprep.subr.bf16.mxu1 %v3023_v39  ;;  %v883_v53 = vmax.f32 %v814_v45, 0.0  ;;  %v3051_v36 = vld [vmem:[#allocation7 + $0x2c8] ss:$16 sps:$4 sm:$0xff]   ;;  %v881_v37 = vmax.f32 %v863_v31, 0.0  ;;  %v867_v38 = vadd.f32 %v866_v34, %v436_v63  ;;  %v868_v39 = vpop.f32.mrb[7].mxu1  ;;  %v3116_v32 = vld [vmem:[#allocation8 + $0x50] sm:$0xff]  }
 0x1a8   : > { %v884_v54 = vmax.f32 %v816_v50, 0.0  ;;  %v890_v29 = vpack.c.bf16 %v878_v23, %v874_v20  ;;  %v3056_v40 = vld [vmem:[#allocation7 + $0x2e4] ss:$16 sps:$4 sm:$0xff]   ;;  %v882_v42 = vmax.f32 %v865_v33, 0.0  ;;  %v869_v43 = vadd.f32 %v868_v39, %v440_v0  ;;  %v3054_v46 = vld [vmem:[#allocation7 + $0x2e0] ss:$16 sps:$4 sm:$0xff]  }
 0x1a9   : > { %v891_v56 = vpack.c.bf16 %v883_v53, %v879_v44  ;;  %v885_v44 = vmax.f32 %v867_v38, 0.0  ;;  %v3065_v50 = vld [vmem:[#allocation7 + $0x30c] ss:$16 sps:$4 sm:$0xff]   ;;  %v3063_v53 = vld [vmem:[#allocation7 + $0x308] ss:$16 sps:$4 sm:$0xff]   ;;  %v3108_v23 = vld [vmem:[#allocation8 + $0x40] sm:$0xff]  }
 0x1aa   : > { %1740 = vmatpush1.bf16.msra.mxu0 %v3018_v47  ;;  %1846 = vmatpush1.bf16.msra.mxu1 %v3021_v48  ;;  %v892_v60 = vpack.c.bf16 %v884_v54, %v880_v49  ;;  %v886_v45 = vmax.f32 %v869_v43, 0.0  ;;  %v3057_v47 = vld [vmem:[#allocation7 + $0x2e8] ss:$16 sps:$4 sm:$0xff]   ;;  %v3062_v49 = vld [vmem:[#allocation7 + $0x304] ss:$16 sps:$4 sm:$0xff]  }
 0x1ab   : > { %1741 = vmatprep.subr.bf16.mxu0 %v3026_v51  ;;  %1847 = vmatprep.subr.bf16.mxu1 %v3029_v52  ;;  %v3627_v48 = vpack.c.bf16 %v885_v44, %v881_v37  ;;  %v3060_v52 = vld [vmem:[#allocation7 + $0x300] ss:$16 sps:$4 sm:$0xff]   ;;  %v3068_v54 = vld [vmem:[#allocation7 + $0x324] ss:$16 sps:$4 sm:$0xff]   ;;  %v3075_v63 = vld [vmem:[#allocation7 + $0x348] ss:$16 sps:$4 sm:$0xff]  }
 0x1ac   : > { %1726 = vmatprep.mubr.bf16.mxu0 %v892_v60  ;;  %1832 = vmatprep.mubr.bf16.mxu1 %v892_v60  ;;  %v3629_v51 = vpack.c.bf16 %v886_v45, %v882_v42  ;;  %v3074_v60 = vld [vmem:[#allocation7 + $0x344] ss:$16 sps:$4 sm:$0xff]   ;;  %v3107_v20 = vld [vmem:[#allocation7 + $0x3ec] ss:$16 sps:$4 sm:$0xff]  }
 0x1ad   : > { %1727 = vmatmul.mubr.bf16.gmra.mrb[12].mxu0 %v891_v56  ;;  %1833 = vmatmul.mubr.bf16.gmra.mrb[12].mxu1 %v891_v56  ;;  %v3071_v56 = vld [vmem:[#allocation7 + $0x32c] ss:$16 sps:$4 sm:$0xff]   ;;  %v3080_v0 = vld [vmem:[#allocation7 + $0x364] ss:$16 sps:$4 sm:$0xff]  }
 0x1ae   : > { %1742 = vmatpush1.bf16.msra.mxu0 %v3024_v58  ;;  %1848 = vmatpush1.bf16.msra.mxu1 %v3027_v59  ;;  %v3066_v58 = vld [vmem:[#allocation7 + $0x320] ss:$16 sps:$4 sm:$0xff]   ;;  %v3069_v59 = vld [vmem:[#allocation7 + $0x328] ss:$16 sps:$4 sm:$0xff]   ;;  %v3092_v8 = vld [vmem:[#allocation7 + $0x3a4] ss:$16 sps:$4 sm:$0xff]  }
 0x1af   : > { %1743 = vmatprep.subr.bf16.mxu0 %v3032_v61  ;;  %1849 = vmatprep.subr.bf16.mxu1 %v3035_v62  ;;  %v3077_v61 = vld [vmem:[#allocation7 + $0x34c] ss:$16 sps:$4 sm:$0xff]   ;;  %v3072_v62 = vld [vmem:[#allocation7 + $0x340] ss:$16 sps:$4 sm:$0xff]  }
 0x1b0   : > { %1769 = vmatprep.mubr.bf16.mxu0 %v890_v29  ;;  %1875 = vmatprep.mubr.bf16.mxu1 %v890_v29  ;;  %v3113_v29 = vld [vmem:[#allocation8 + $0xc8] sm:$0xff]   ;;  %v3117_v33 = vld [vmem:[#allocation8 + $0xd0] sm:$0xff]   ;;  %v3122_v37 = vld [vmem:[#allocation8 + $0x18] sm:$0xff]  }
 0x1b1   : > { %v3115_v31 = vld [vmem:[#allocation8 + $0x88] sm:$0xff]   ;;  %v3118_v34 = vld [vmem:[#allocation8 + $0x10] sm:$0xff]   ;;  %v3123_v38 = vld [vmem:[#allocation8 + $0x98] sm:$0xff]  }
 0x1b2   : > { %1744 = vmatpush1.bf16.msra.mxu0 %v3030_v1  ;;  %1850 = vmatpush1.bf16.msra.mxu1 %v3033_v2  ;;  %v3083_v1 = vld [vmem:[#allocation7 + $0x36c] ss:$16 sps:$4 sm:$0xff]   ;;  %v3078_v2 = vld [vmem:[#allocation7 + $0x360] ss:$16 sps:$4 sm:$0xff]  }
 0x1b3   : > { %1745 = vmatprep.subr.bf16.mxu0 %v3038_v3  ;;  %1851 = vmatprep.subr.bf16.mxu1 %v3041_v4  ;;  %v3081_v3 = vld [vmem:[#allocation7 + $0x368] ss:$16 sps:$4 sm:$0xff]   ;;  %v3086_v4 = vld [vmem:[#allocation7 + $0x384] ss:$16 sps:$4 sm:$0xff]  }
 0x1b4   : > { %v3124_v39 = vld [vmem:[#allocation8 + $0x60] sm:$0xff]   ;;  %v3128_v43 = vld [vmem:[#allocation8 + $0x68] sm:$0xff]  }
 0x1b5   : > { %v3127_v42 = vld [vmem:[#allocation8 + $0xa0] sm:$0xff]   ;;  %v3129_v44 = vld [vmem:[#allocation8 + $0xe8] sm:$0xff]  }
 0x1b6   : > { %1746 = vmatpush1.bf16.msra.mxu0 %v3036_v10  ;;  %1852 = vmatpush1.bf16.msra.mxu1 %v3039_v11  ;;  %v3090_v10 = vld [vmem:[#allocation7 + $0x3a0] ss:$16 sps:$4 sm:$0xff]   ;;  %v3093_v11 = vld [vmem:[#allocation7 + $0x3a8] ss:$16 sps:$4 sm:$0xff]  }
 0x1b7   : > { %1747 = vmatprep.subr.bf16.mxu0 %v3044_v17  ;;  %1853 = vmatprep.subr.bf16.mxu1 %v3047_v19  ;;  %v3099_v17 = vld [vmem:[#allocation7 + $0x3c8] ss:$16 sps:$4 sm:$0xff]   ;;  %v3104_v19 = vld [vmem:[#allocation7 + $0x3e4] ss:$16 sps:$4 sm:$0xff]  }
 0x1b8   : > { %v3130_v45 = vld [vmem:[#allocation8 + $0x28] sm:$0xff]  }
 0x1ba   : > { %1748 = vmatpush1.bf16.msra.mxu0 %v3042_v24  ;;  %1854 = vmatpush1.bf16.msra.mxu1 %v3045_v25  ;;  %v3109_v24 = vld [vmem:[#allocation8 + $0xc0] sm:$0xff]  }
 0x1bb   : > { %1749 = vmatprep.subr.bf16.mxu0 %v3050_v27  ;;  %1855 = vmatprep.subr.bf16.mxu1 %v3053_v28  ;;  %v3110_v25 = vld [vmem:[#allocation8] sm:$0xff]   ;;  %v3112_v28 = vld [vmem:[#allocation8 + $0x48] sm:$0xff]  }
 0x1bc   : > { %v3111_v27 = vld [vmem:[#allocation8 + $0x80] sm:$0xff]  }
 0x1be   : > { %1750 = vmatpush1.bf16.msra.mxu0 %v3048_v35  ;;  %1856 = vmatpush1.bf16.msra.mxu1 %v3051_v36  ;;  %v3119_v35 = vld [vmem:[#allocation8 + $0x90] sm:$0xff]   ;;  %v3120_v36 = vld [vmem:[#allocation8 + $0x58] sm:$0xff]  }
 0x1bf   : > { %1751 = vmatprep.subr.bf16.mxu0 %v3056_v40  ;;  %1857 = vmatprep.subr.bf16.mxu1 %v3059_v41  ;;  %v3125_v40 = vld [vmem:[#allocation8 + $0xe0] sm:$0xff]  }
 0x1c0   : > { %v3126_v41 = vld [vmem:[#allocation8 + $0x20] sm:$0xff]  }
 0x1c2   : > { %1752 = vmatpush1.bf16.msra.mxu0 %v3054_v46  ;;  %1858 = vmatpush1.bf16.msra.mxu1 %v3057_v47  ;;  %v3131_v46 = vld [vmem:[#allocation8 + $0xa8] sm:$0xff]   ;;  %v3132_v47 = vld [vmem:[#allocation8 + $0x70] sm:$0xff]  }
 0x1c3   : > { %1753 = vmatprep.subr.bf16.mxu0 %v3062_v49  ;;  %1859 = vmatprep.subr.bf16.mxu1 %v3065_v50  ;;  %v3134_v49 = vld [vmem:[#allocation8 + $0x30] sm:$0xff]  }
 0x1c4   : > { %v3135_v50 = vld [vmem:[#allocation8 + $0xb0] sm:$0xff]  }
 0x1c6   : > { %1754 = vmatpush1.bf16.msra.mxu0 %v3060_v52  ;;  %1860 = vmatpush1.bf16.msra.mxu1 %v3063_v53  ;;  %v3137_v52 = vld [vmem:[#allocation8 + $0xf8] sm:$0xff]  }
 0x1c7   : > { %1755 = vmatprep.subr.bf16.mxu0 %v3068_v54  ;;  %1861 = vmatprep.subr.bf16.mxu1 %v3071_v56  ;;  %v3138_v53 = vld [vmem:[#allocation8 + $0x38] sm:$0xff]   ;;  %v346_v56 = vld [vmem:[%s3705_s4] sm:$0xf] }
 0x1c8   : > { %v3139_v54 = vld [vmem:[#allocation8 + $0xb8] sm:$0xff]  }
 0x1ca   : > { %1756 = vmatpush1.bf16.msra.mxu0 %v3066_v58  ;;  %1862 = vmatpush1.bf16.msra.mxu1 %v3069_v59  ;;  %v1027_v58 = vrot.slane %v346_v56, %v427_v16  ;;  %v1035_v59 = vrot.slane %v346_v56, %v435_v55 }
 0x1cb   : > { %1757 = vmatprep.subr.bf16.mxu0 %v3074_v60  ;;  %1863 = vmatprep.subr.bf16.mxu1 %v3077_v61  ;;  %v1031_v60 = vrot.slane %v346_v56, %v431_v18  ;;  %v1039_v61 = vrot.slane %v346_v56, %v439_v57 }
 0x1ce   : > { %1758 = vmatpush1.bf16.msra.mxu0 %v3072_v62  ;;  %1864 = vmatpush1.bf16.msra.mxu1 %v3075_v63 }
 0x1cf   : > { %1759 = vmatprep.subr.bf16.mxu0 %v3080_v0  ;;  %1865 = vmatprep.subr.bf16.mxu1 %v3083_v1 }
 0x1d2   : > { %1760 = vmatpush1.bf16.msra.mxu0 %v3078_v2  ;;  %1866 = vmatpush1.bf16.msra.mxu1 %v3081_v3 }
 0x1d3   : > { %1761 = vmatprep.subr.bf16.mxu0 %v3086_v4  ;;  %1867 = vmatprep.subr.bf16.mxu1 %v3089_v5 }
 0x1d6   : > { %1762 = vmatpush1.bf16.msra.mxu0 %v3084_v6  ;;  %1868 = vmatpush1.bf16.msra.mxu1 %v3087_v7 }
 0x1d7   : > { %1763 = vmatprep.subr.bf16.mxu0 %v3092_v8  ;;  %1869 = vmatprep.subr.bf16.mxu1 %v3095_v9 }
 0x1da   : > { %1764 = vmatpush1.bf16.msra.mxu0 %v3090_v10  ;;  %1870 = vmatpush1.bf16.msra.mxu1 %v3093_v11 }
 0x1db   : > { %1765 = vmatprep.subr.bf16.mxu0 %v3098_v12  ;;  %1871 = vmatprep.subr.bf16.mxu1 %v3101_v13 }
 0x1de   : > { %1766 = vmatpush1.bf16.msra.mxu0 %v3096_v14  ;;  %1872 = vmatpush1.bf16.msra.mxu1 %v3099_v17 }
 0x1df   : > { %1767 = vmatprep.subr.bf16.mxu0 %v3104_v19  ;;  %1873 = vmatprep.subr.bf16.mxu1 %v3107_v20 }
 0x1e2   : > { %1768 = vmatpush1.bf16.msra.mxu0 %v3102_v21  ;;  %1874 = vmatpush1.bf16.msra.mxu1 %v3105_v22 }
 0x1e3   : > { %2649 = vmatprep.subr.bf16.mxu0 %v3108_v23  ;;  %2677 = vmatprep.subr.bf16.mxu1 %v3109_v24 }
 0x1e5   : > { %1770 = vmatmul.mubr.bf16.vlgmr.msra.gmra.mrb[8].mxu0 %v3625_v26  ;;  %1876 = vmatmul.mubr.bf16.vlgmr.msra.gmra.mrb[8].mxu1 %v3625_v26  ;;  %v3121_v26 = vld [vmem:[#allocation8 + $0xd8] sm:$0xff]  }
 0x1e6   : > { %1779 = vmatprep.mubr.bf16.mxu0 %v3629_v51  ;;  %1885 = vmatprep.mubr.bf16.mxu1 %v3629_v51  ;;  %v3136_v51 = vld [vmem:[#allocation8 + $0x78] sm:$0xff]  }
 0x1e7   : > { %2650 = vmatpush3.bf16.msra.mxu0 %v3110_v25  ;;  %2678 = vmatpush3.bf16.msra.mxu1 %v3111_v27 }
 0x1e8   : > { %2651 = vmatprep.subr.bf16.mxu0 %v3112_v28  ;;  %2679 = vmatprep.subr.bf16.mxu1 %v3113_v29 }
 0x1eb   : > { %2652 = vmatpush3.bf16.msra.mxu0 %v3114_v30  ;;  %2680 = vmatpush3.bf16.msra.mxu1 %v3115_v31 }
 0x1ec   : > { %2653 = vmatprep.subr.bf16.mxu0 %v3116_v32  ;;  %2681 = vmatprep.subr.bf16.mxu1 %v3117_v33 }
 0x1ed   : > { %1780 = vmatmul.mubr.bf16.gmra.mrb[12].mxu0 %v3627_v48  ;;  %1886 = vmatmul.mubr.bf16.gmra.mrb[12].mxu1 %v3627_v48  ;;  %v3133_v48 = vld [vmem:[#allocation8 + $0xf0] sm:$0xff]  }
 0x1ef   : > { %2654 = vmatpush3.bf16.msra.mxu0 %v3118_v34  ;;  %2682 = vmatpush3.bf16.msra.mxu1 %v3119_v35 }
 0x1f0   : > { %2655 = vmatprep.subr.bf16.mxu0 %v3120_v36  ;;  %2683 = vmatprep.subr.bf16.mxu1 %v3121_v26 }
 0x1f3   : > { %2656 = vmatpush3.bf16.msra.mxu0 %v3122_v37  ;;  %2684 = vmatpush3.bf16.msra.mxu1 %v3123_v38 }
 0x1f4   : > { %2657 = vmatprep.subr.bf16.mxu0 %v3124_v39  ;;  %2685 = vmatprep.subr.bf16.mxu1 %v3125_v40 }
 0x1f7   : > { %2658 = vmatpush3.bf16.msra.mxu0 %v3126_v41  ;;  %2686 = vmatpush3.bf16.msra.mxu1 %v3127_v42 }
 0x1f8   : > { %2659 = vmatprep.subr.bf16.mxu0 %v3128_v43  ;;  %2687 = vmatprep.subr.bf16.mxu1 %v3129_v44 }
 0x1fb   : > { %2660 = vmatpush3.bf16.msra.mxu0 %v3130_v45  ;;  %2688 = vmatpush3.bf16.msra.mxu1 %v3131_v46 }
 0x1fc   : > { %2661 = vmatprep.subr.bf16.mxu0 %v3132_v47  ;;  %2689 = vmatprep.subr.bf16.mxu1 %v3133_v48 }
 0x1ff   : > { %2662 = vmatpush3.bf16.msra.mxu0 %v3134_v49  ;;  %2690 = vmatpush3.bf16.msra.mxu1 %v3135_v50 }
 0x200   : > { %2663 = vmatprep.subr.bf16.mxu0 %v3136_v51  ;;  %2691 = vmatprep.subr.bf16.mxu1 %v3137_v52 }
 0x203   : > { %2664 = vmatpush3.bf16.msra.mxu0 %v3138_v53  ;;  %2692 = vmatpush3.bf16.msra.mxu1 %v3139_v54  ;;  %v2608_v54 = vld [vmem:[%s3707_s6] ss:$0 sm:$0xff] }
 0x2b8   : > { %v1771_v62 = vpop.f32.mrb[8].mxu0  ;;  %v1877_v63 = vpop.f32.mrb[8].mxu1 }
 0x2b9   : > { %v2705_v0 = vadd.f32 %v1771_v62, %v1027_v58  ;;  %v2713_v1 = vadd.f32 %v1877_v63, %v1035_v59  ;;  %v1773_v2 = vpop.f32.mrb[9].mxu0  ;;  %v1879_v3 = vpop.f32.mrb[9].mxu1 }
 0x2ba   : > { %v2706_v4 = vadd.f32 %v1773_v2, %v1031_v60  ;;  %v2714_v5 = vadd.f32 %v1879_v3, %v1039_v61  ;;  %v1775_v6 = vpop.f32.mrb[10].mxu0  ;;  %v1881_v7 = vpop.f32.mrb[10].mxu1 }
 0x2bb   : > { %v2707_v16 = vadd.f32 %v1775_v6, %v1027_v58  ;;  %v2715_v8 = vadd.f32 %v1881_v7, %v1035_v59  ;;  %v1777_v9 = vpop.f32.mrb[11].mxu0  ;;  %v1883_v55 = vpop.f32.mrb[11].mxu1  ;;  %v1896_v18 = vmax.f32 %v2705_v0, 0.0  ;;  %v1898_v12 = vmax.f32 %v2713_v1, 0.0 }
 0x2bc   : > { %v2708_v10 = vadd.f32 %v1777_v9, %v1031_v60  ;;  %v2716_v11 = vadd.f32 %v1883_v55, %v1039_v61  ;;  %v1897_v13 = vmax.f32 %v2706_v4, 0.0  ;;  %v1899_v14 = vmax.f32 %v2714_v5, 0.0 }
 0x2bd   : > { %v1900_v15 = vmax.f32 %v2707_v16, 0.0  ;;  %v1902_v57 = vmax.f32 %v2715_v8, 0.0 }
 0x2be   : > { %v1901_v17 = vmax.f32 %v2708_v10, 0.0  ;;  %v1903_v19 = vmax.f32 %v2716_v11, 0.0 }
 0x2bf   : > { %v1912_v20 = vpack.c.bf16 %v1900_v15, %v1896_v18  ;;  %v1914_v21 = vpack.c.bf16 %v1902_v57, %v1898_v12 }
 0x2c0   : > { %v1913_v22 = vpack.c.bf16 %v1901_v17, %v1897_v13  ;;  %v1915_v23 = vpack.c.bf16 %v1903_v19, %v1899_v14  ;;  %v1781_v24 = vpop.f32.mrb[12].mxu0  ;;  %v1887_v25 = vpop.f32.mrb[12].mxu1 }
 0x2c1   : > { %v2709_v27 = vadd.f32 %v1781_v24, %v1027_v58  ;;  %v2717_v28 = vadd.f32 %v1887_v25, %v1035_v59  ;;  %v1783_v29 = vpop.f32.mrb[13].mxu0  ;;  %v1889_v30 = vpop.f32.mrb[13].mxu1 }
 0x2c2   : > { %v2710_v31 = vadd.f32 %v1783_v29, %v1031_v60  ;;  %v2718_v32 = vadd.f32 %v1889_v30, %v1039_v61  ;;  %v1785_v33 = vpop.f32.mrb[14].mxu0  ;;  %v1891_v34 = vpop.f32.mrb[14].mxu1  ;;  %2214 = vmatprep.mubr.bf16.mxu0 %v1913_v22  ;;  %2263 = vmatprep.mubr.bf16.mxu1 %v1915_v23 }
 0x2c3   : > { %v2711_v35 = vadd.f32 %v1785_v33, %v1027_v58  ;;  %v2719_v36 = vadd.f32 %v1891_v34, %v1035_v59  ;;  %v1787_v26 = vpop.f32.mrb[15].mxu0  ;;  %v1893_v37 = vpop.f32.mrb[15].mxu1  ;;  %2215 = vmatmul.mubr.bf16.vlgmr.msra.gmra.mrb[16].mxu0 %v1912_v20  ;;  %2264 = vmatmul.mubr.bf16.vlgmr.msra.gmra.mrb[16].mxu1 %v1914_v21  ;;  %v1904_v40 = vmax.f32 %v2709_v27, 0.0  ;;  %v1906_v41 = vmax.f32 %v2717_v28, 0.0 }
 0x2c4   : > { %v2712_v38 = vadd.f32 %v1787_v26, %v1031_v60  ;;  %v2720_v39 = vadd.f32 %v1893_v37, %v1039_v61  ;;  %v1905_v44 = vmax.f32 %v2710_v31, 0.0  ;;  %v1907_v45 = vmax.f32 %v2718_v32, 0.0 }
 0x2c5   : > { %v1908_v42 = vmax.f32 %v2711_v35, 0.0  ;;  %v1910_v43 = vmax.f32 %v2719_v36, 0.0 }
 0x2c6   : > { %v1909_v46 = vmax.f32 %v2712_v38, 0.0  ;;  %v1911_v47 = vmax.f32 %v2720_v39, 0.0 }
 0x2c7   : > { %v1916_v48 = vpack.c.bf16 %v1908_v42, %v1904_v40  ;;  %v1918_v49 = vpack.c.bf16 %v1910_v43, %v1906_v41 }
 0x2c8   : > { %v1917_v50 = vpack.c.bf16 %v1909_v46, %v1905_v44  ;;  %v1919_v51 = vpack.c.bf16 %v1911_v47, %v1907_v45 }
 0x2ca   : > { %2222 = vmatprep.mubr.bf16.mxu0 %v1917_v50  ;;  %2271 = vmatprep.mubr.bf16.mxu1 %v1919_v51 }
 0x2cb   : > { %2223 = vmatmul.mubr.bf16.gmra.mrb[20].mxu0 %v1916_v48  ;;  %2272 = vmatmul.mubr.bf16.gmra.mrb[20].mxu1 %v1918_v49 }
 0x396   : > { %v2665_v52 = vpop.f32.mrb[16].mxu0  ;;  %v2693_v53 = vpop.f32.mrb[16].mxu1 }
 0x397   : > { %v2666_v56 = vpop.f32.mrb[17].mxu0  ;;  %v2694_v58 = vpop.f32.mrb[17].mxu1 }
 0x398   : > { %v2667_v59 = vadd.f32 %v2666_v56, %v2665_v52  ;;  %v2695_v60 = vadd.f32 %v2694_v58, %v2693_v53  ;;  %v2668_v61 = vpop.f32.mrb[18].mxu0  ;;  %v2696_v62 = vpop.f32.mrb[18].mxu1 }
 0x399   : > { %v2669_v63 = vpop.f32.mrb[19].mxu0  ;;  %v2697_v0 = vpop.f32.mrb[19].mxu1 }
 0x39a   : > { %v2217_v1 = vadd.f32 %v2667_v59, %v2608_v54  ;;  %v2670_v2 = vadd.f32 %v2669_v63, %v2668_v61  ;;  %v2698_v3 = vadd.f32 %v2697_v0, %v2696_v62 }
 0x39c   : > { %v2266_v4 = vadd.f32 %v2695_v60, %v2217_v1  ;;  %v2220_v5 = vadd.f32 %v2670_v2, %v2608_v54 }
 0x39e   : > { %2280 = vst [vmem:[%s341_s19] sm:$0xff] %v2266_v4  ;;  %v2269_v6 = vadd.f32 %v2698_v3, %v2220_v5  ;;  %v2671_v7 = vpop.f32.mrb[20].mxu0  ;;  %v2699_v16 = vpop.f32.mrb[20].mxu1 }
 0x39f   : > { %v2672_v8 = vpop.f32.mrb[21].mxu0  ;;  %v2700_v9 = vpop.f32.mrb[21].mxu1 }
 0x3a0   : > { %2281 = vst [vmem:[%s341_s19 + $0x8] sm:$0xff] %v2269_v6  ;;  %v2673_v55 = vadd.f32 %v2672_v8, %v2671_v7  ;;  %v2701_v10 = vadd.f32 %v2700_v9, %v2699_v16  ;;  %v2674_v11 = vpop.f32.mrb[22].mxu0  ;;  %v2702_v18 = vpop.f32.mrb[22].mxu1 }
 0x3a1   : > { %v2675_v12 = vpop.f32.mrb[23].mxu0  ;;  %v2703_v15 = vpop.f32.mrb[23].mxu1 }
 0x3a2   : > { %v2225_v57 = vadd.f32 %v2673_v55, %v2608_v54  ;;  %v2676_v13 = vadd.f32 %v2675_v12, %v2674_v11  ;;  %v2704_v14 = vadd.f32 %v2703_v15, %v2702_v18 }
 0x3a4   : > { %v2274_v17 = vadd.f32 %v2701_v10, %v2225_v57  ;;  %v2228_v19 = vadd.f32 %v2676_v13, %v2608_v54 }
 0x3a6   : > { %2282 = vst [vmem:[%s341_s19 + $0x10] sm:$0xff] %v2274_v17  ;;  %v2277_v20 = vadd.f32 %v2704_v14, %v2228_v19 }
 0x3a8   : > { %2283 = vst [vmem:[%s341_s19 + $0x18] sm:$0xff] %v2277_v20 }
 0x3a9   : > { %3267 = shalt.err (!%p3264_p4)
}
 0x3aa   : > { %s3268_s15 = scalar_lea.hbm %s3658_s22, 512  ;;  %s3272_s17 = scalar_lea.hbm %s3708_s7, 4096 }
 0x3ab   : > { %p3269_p9 = scmp.ne.s32.totalorder %s3658_s22, %s3268_s15  ;;  %p3273_p8 = scmp.lt.u32.totalorder %s3658_s22, %s3708_s7 }
 0x3ac   : > { %p3274_p12 = scmp.lt.u32.totalorder %s3272_s17, %s3268_s15  ;;  %p3276_p0 = scmp.lt.u32.totalorder %s3268_s15, %s3658_s22 }
 0x3ad   : > { %p3270_p13 = pnand %p3269_p9, %p3531_p5 }
 0x3ae   : > { %p3275_p6 = por %p3274_p12, %p3273_p8 }
 0x3af   : > { %p3271_p10 = pneg %p3270_p13 }
 0x3b0   : > { %p3277_p3 = por %p3276_p0, %p3275_p6 }
 0x3b2   : > { %p3278_p7 = pnand %p3277_p3, %p3271_p10 }
 0x3b4   : > { %3281 = shalt.err (!%p3278_p7)
}
 0x3b5   : > { %s3339_s11 = smov 128   ;;  %s3340_s10 = smov 8  }
 0x3b6   : > { %2751 = dma.vmem_to_hbm [thread:$0]  (%p3531_p5), %s3653_s29, 512, %s3658_s22, %s2285_s12, %s3339_s11, %s3339_s11, %s3340_s10  }
 0x3b7 PF: > { %s3728_s30 = sld [smem:[#allocation15_spill]]  ;;  %p2778_p11 = scmp.ge.s32.totalorder %s3328_s27, 2 }
 0x3b8   : > { %s2313_s28 = sand.u32 1, %s3316_s24  }
 0x3b9   : > { %s2314_s9 = scalar_lea.sflag [#allocation4], %s2313_s28 }
 0x3bd   : > { %p3729_p1 = scmp.ne.s32.totalorder %s3728_s30, 0 }
 0x3bf   : > { %p2768_p2 = pnand %p2778_p11, %p3729_p1 }
 0x3c1   : > { %3311 = dma.done.wait (!%p2768_p2), %s2314_s9, 512  }
 0x3c2   : > { %3313 = vsyncadd (!%p2768_p2), %s2314_s9, 4294966784  ;;  %p22_p4 = scmp.ge.s32.totalorder %s3517_s18, 10   ;;  %s3730_s24 = smov %s3320_s25 }
 0x3c3   : > { %s3731_s25 = smov %s3324_s26  ;;  %s3732_s26 = smov %s3527_s21 }
 0x3c4   : > { %s3733_s27 = smov %s3517_s18  ;;  %24 = sbr.rel (!%p22_p4) target bundleno = 7 (0x7), region = 105 }
 0x3cb   :  { %2319 = vsyncpa [#allocation3], 1 }
 0x3cc   :  { %2321 = vsyncpa [#allocation3 + $0x1], 1 }
 0x3cd   :  { %2322 = vsyncpa [#allocation6], 1 }
 0x3ce   :  { %2323 = vsyncpa [#allocation9], 1 }
 0x3cf   :  { %2324 = vsyncpa [#allocation4], 1 }
 0x3d0   :  { %2326 = vsyncpa [#allocation4 + $0x1], 1 }

</bundles_post_ra>
